<compile_context>
chip_gen: v7x
topology: tpu7x:2x2x1
jax: 0.10.0
libtpu: 0.0.40
codegen_flags: <defaults>
</compile_context>

<pallas_src>
import functools

import jax
import jax.numpy as jnp
import numpy as np
from jax.experimental import pallas as pl
from jax.experimental.pallas import tpu as pltpu

EPS = 1e-5          # nn.BatchNorm2d default eps
LANE = 128          # TPU lane width; channel / K dims padded to a multiple of this


def _round_up(x, m):
    return (x + m - 1) // m * m


# ---------------------------------------------------------------------------
# Per-generation configuration + feature probe
# ---------------------------------------------------------------------------
def _chip_config():
    try:
        kind = jax.devices()[0].device_kind.lower()
    except Exception:
        kind = ""
    if any(tag in kind for tag in ("v7", "7x")):
        # v7x: 64 MiB VMEM / 2 TensorCores -> smaller tiles, core-split pass 1,
        # default (2-deep) streaming, rely on Buffered(1) residents for headroom.
        return dict(tm=512, vmem=48 * 1024 * 1024, stream_buffers=2, ncores=2)
    # v5e / v6e (128 MiB VMEM, 1 TC): bigger tiles, deeper streamed pipeline.
    return dict(tm=1024, vmem=96 * 1024 * 1024, stream_buffers=3, ncores=1)


def _probe_pipeline_mode():
    """Compile+run a tiny kernel using pipeline_mode=pl.Buffered(1/3); fall back
    to default double-buffering if this jax build rejects it."""
    try:
        def k(a_ref, b_ref, o_ref):
            o_ref[...] = a_ref[...] + b_ref[...]
        f = pl.pallas_call(
            k, grid=(2,),
            in_specs=[pl.BlockSpec((8, 128), lambda i: (i, 0),
                                   pipeline_mode=pl.Buffered(3)),
                      pl.BlockSpec((8, 128), lambda i: (0, 0),
                                   pipeline_mode=pl.Buffered(1))],
            out_specs=pl.BlockSpec((8, 128), lambda i: (i, 0)),
            out_shape=jax.ShapeDtypeStruct((16, 128), jnp.float32))
        jax.block_until_ready(f(jnp.ones((16, 128), jnp.float32),
                                jnp.ones((8, 128), jnp.float32)))
        return True
    except Exception:
        return False


_CFG = _chip_config()
_PIPELINE_MODE_OK = _probe_pipeline_mode()


def _spec(shape, index_map, buffers=None):
    """BlockSpec with an optional buffer-count hint (1 = resident, >2 = deeper)."""
    if buffers is None or buffers == 2 or not _PIPELINE_MODE_OK:
        return pl.BlockSpec(shape, index_map)
    return pl.BlockSpec(shape, index_map, pipeline_mode=pl.Buffered(buffers))


# ---------------------------------------------------------------------------
# Pallas kernels
# ---------------------------------------------------------------------------
def _conv_stats_kernel(cols_ref, w_ref, b_ref, y_ref, sum_ref, sq_ref,
                       *, tm, m_true, inner, has_pad):
    """Pass 1: conv as a single K = 9*Cin matmul + bias, plus per-core BN partials.

    cols_ref: (TM, Kp) bf16   w_ref: (Kp, Cp) bf16   b_ref: (1, Cp) f32
    y_ref:    (TM, Cp) bf16 (internal intermediate; stats use the f32 value)
    sum_ref / sq_ref: (1, 1, Cp) f32 resident per-core accumulators.
    """
    c = pl.program_id(0)
    i = pl.program_id(1)

    acc = jnp.dot(cols_ref[...], w_ref[...], preferred_element_type=jnp.float32)
    y = acc + b_ref[...]
    y_ref[...] = y.astype(y_ref.dtype)           # bf16 HBM round trip to pass 2

    @pl.when(i == 0)
    def _init():
        sum_ref[...] = jnp.zeros_like(sum_ref)
        sq_ref[...] = jnp.zeros_like(sq_ref)

    def _accum(yv):
        sum_ref[...] += jnp.sum(yv, axis=0, keepdims=True).reshape(sum_ref.shape)
        sq_ref[...] += jnp.sum(yv * yv, axis=0, keepdims=True).reshape(sq_ref.shape)

    if not has_pad:
        _accum(y)
    else:
        row0 = (c * inner + i) * tm               # first global row of this tile

        @pl.when(row0 + tm <= m_true)             # fully-real tile: no mask work
        def _full():
            _accum(y)

        @pl.when(row0 + tm > m_true)              # tile overlaps grid padding
        def _masked():
            rows = row0 + jax.lax.broadcasted_iota(jnp.int32, (tm, 1), 0)
            _accum(jnp.where(rows < m_true, y, 0.0))


def _bn_relu_kernel(y_ref, scale_ref, shift_ref, o_ref):
    """Pass 2 (conv1): BN scale/shift + ReLU (f32 math, bf16 in/out)."""
    z = jnp.maximum(y_ref[...] * scale_ref[...] + shift_ref[...], 0.0)
    o_ref[...] = z.astype(o_ref.dtype)


def _bn_relu_add_relu_kernel(y_ref, scale_ref, shift_ref, res_ref, o_ref):
    """Pass 2 (conv2, identity shortcut): BN + ReLU, + residual, final ReLU."""
    z = jnp.maximum(y_ref[...] * scale_ref[...] + shift_ref[...], 0.0)
    o_ref[...] = jnp.maximum(z + res_ref[...].astype(jnp.float32), 0.0).astype(o_ref.dtype)


def _bn_relu_proj_add_relu_kernel(y_ref, scale_ref, shift_ref, xs_ref, wsc_ref, o_ref):
    """Pass 2 (conv2, downsample): fuse the 1x1 stride-2 shortcut matmul with
    BN + ReLU + residual add + final ReLU (projection rides the idle MXU)."""
    res = jnp.dot(xs_ref[...], wsc_ref[...], preferred_element_type=jnp.float32)
    z = jnp.maximum(y_ref[...] * scale_ref[...] + shift_ref[...], 0.0)
    o_ref[...] = jnp.maximum(z + res, 0.0).astype(o_ref.dtype)


# ---------------------------------------------------------------------------
# pallas_call wrappers
# ---------------------------------------------------------------------------
def _conv_bias_stats(cols, w, bias_row, tm, m_true, cfg):
    mpad, kp = cols.shape
    cp = w.shape[1]
    ncores = cfg["ncores"]
    inner = mpad // (tm * ncores)
    has_pad = mpad != m_true
    cost = pl.CostEstimate(
        flops=2 * mpad * kp * cp, transcendentals=0,
        bytes_accessed=mpad * kp * 2 + kp * cp * 2 + mpad * cp * 2
        + cp * 4 + 2 * ncores * cp * 4)
    return pl.pallas_call(
        functools.partial(_conv_stats_kernel, tm=tm, m_true=m_true,
                          inner=inner, has_pad=has_pad),
        grid=(ncores, inner),
        in_specs=[
            _spec((tm, kp), lambda c, i: (c * inner + i, 0),
                  cfg["stream_buffers"]),                       # im2col tiles (streamed)
            _spec((kp, cp), lambda c, i: (0, 0), 1),            # weights (resident, 1 buffer)
            _spec((1, cp), lambda c, i: (0, 0), 1),             # bias (resident)
        ],
        out_specs=(
            pl.BlockSpec((tm, cp), lambda c, i: (c * inner + i, 0)),   # y tiles (bf16)
            pl.BlockSpec((1, 1, cp), lambda c, i: (c, 0, 0)),          # per-core sum
            pl.BlockSpec((1, 1, cp), lambda c, i: (c, 0, 0)),          # per-core sumsq
        ),
        out_shape=(
            jax.ShapeDtypeStruct((mpad, cp), jnp.bfloat16),
            jax.ShapeDtypeStruct((ncores, 1, cp), jnp.float32),
            jax.ShapeDtypeStruct((ncores, 1, cp), jnp.float32),
        ),
        # outer axis: per-core split (v7x megacore); inner axis carries the
        # resident per-core BN-stat accumulators -> "arbitrary".
        compiler_params=pltpu.CompilerParams(
            dimension_semantics=("parallel", "arbitrary"),
            vmem_limit_bytes=cfg["vmem"]),
        cost_estimate=cost,
    )(cols, w, bias_row)


def _bn_relu_apply(y, scale, shift, tm, out_dtype, cfg, residual=None, xs=None, wsc=None):
    mpad, cp = y.shape
    grid = (mpad // tm,)
    sb = cfg["stream_buffers"]
    in_specs = [
        _spec((tm, cp), lambda i: (i, 0), sb),     # y tiles (bf16, streamed)
        _spec((1, cp), lambda i: (0, 0), 1),       # scale (resident)
        _spec((1, cp), lambda i: (0, 0), 1),       # shift (resident)
    ]
    args = [y, scale, shift]
    if xs is not None:
        kernel = _bn_relu_proj_add_relu_kernel
        in_specs += [_spec((tm, xs.shape[1]), lambda i: (i, 0), sb),
                     _spec(wsc.shape, lambda i: (0, 0), 1)]
        args += [xs, wsc]
    elif residual is not None:
        kernel = _bn_relu_add_relu_kernel
        in_specs += [_spec((tm, cp), lambda i: (i, 0), sb)]
        args += [residual]
    else:
        kernel = _bn_relu_kernel
    return pl.pallas_call(
        kernel,
        grid=grid,
        in_specs=in_specs,
        out_specs=pl.BlockSpec((tm, cp), lambda i: (i, 0)),
        out_shape=jax.ShapeDtypeStruct((mpad, cp), out_dtype),
        # Tiles independent: "parallel" lets v7x's two TensorCores split the grid.
        compiler_params=pltpu.CompilerParams(
            dimension_semantics=("parallel",), vmem_limit_bytes=cfg["vmem"]),
    )(*args)


# ---------------------------------------------------------------------------
# JAX glue (layout only: im2col column building, weight packing, padding)
# ---------------------------------------------------------------------------
def _im2col(x_nhwc, ksize, stride):
    """(N,H,W,C) -> (N*Ho*Wo, ksize*ksize*C), K ordered (kh, kw, cin)."""
    pad = ksize // 2
    xp = jnp.pad(x_nhwc, ((0, 0), (pad, pad), (pad, pad), (0, 0)))
    N, H, W, C = x_nhwc.shape
    Ho = (H + 2 * pad - ksize) // stride + 1
    Wo = (W + 2 * pad - ksize) // stride + 1
    cols = []
    for i in range(ksize):
        for j in range(ksize):
            patch = xp[:, i:i + (Ho - 1) * stride + 1:stride,
                          j:j + (Wo - 1) * stride + 1:stride, :]
            cols.append(patch.reshape(N * Ho * Wo, C))
    return jnp.concatenate(cols, axis=1), (N, Ho, Wo)


def _pack_weight(w_oihw, kp, cp):
    """OIHW -> (Kp, Cp) bf16, K ordered (kh, kw, cin), K and Cout zero-padded."""
    O, I, KH, KW = w_oihw.shape
    w = jnp.transpose(w_oihw, (2, 3, 1, 0)).reshape(KH * KW * I, O)
    return jnp.pad(w, ((0, kp - KH * KW * I), (0, cp - O))).astype(jnp.bfloat16)


def _pad_vec(v, cp):
    return jnp.pad(v.astype(jnp.float32), (0, cp - v.shape[0]))


def _conv_bn(x_nhwc_bf16, w_oihw, bias, gamma, beta, stride, cp, cfg):
    """conv3x3(stride) + bias + training-mode BN statistics -> (y_bf16, scale, shift)."""
    ksize = w_oihw.shape[2]
    cols, (N, Ho, Wo) = _im2col(x_nhwc_bf16, ksize, stride)
    m, k = cols.shape
    kp = _round_up(k, LANE)                               # lane-aligned K
    tm = min(cfg["tm"], _round_up(m, 8))
    mpad = _round_up(m, tm * cfg["ncores"])
    cols = jnp.pad(cols, ((0, mpad - m), (0, kp - k)))
    w = _pack_weight(w_oihw, kp, cp)
    bias_row = _pad_vec(bias, cp).reshape(1, cp)

    y, sum_p, sq_p = _conv_bias_stats(cols, w, bias_row, tm, m, cfg)

    # Finalize the per-channel BN statistics in XLA (O(Cout), negligible).
    # NOTE: E[y^2]-mean^2 in f32 can lose precision for huge M / large |mean|;
    # acceptable here, per-core partials already reduce accumulation length.
    s = jnp.sum(sum_p, axis=(0, 1))
    ss = jnp.sum(sq_p, axis=(0, 1))
    mean = s / m
    var = jnp.maximum(ss / m - mean * mean, 0.0)
    scale = _pad_vec(gamma, cp) * jax.lax.rsqrt(var + EPS)
    shift = _pad_vec(beta, cp) - mean * scale
    return y, scale.reshape(1, cp), shift.reshape(1, cp), tm, m, (N, Ho, Wo)


@functools.partial(jax.jit, static_argnames=("downsample",))
def resnet_block_simple(x_nchw, params, downsample):
    cfg = _CFG
    x = jnp.transpose(x_nchw, (0, 2, 3, 1)).astype(jnp.float32)     # NCHW -> NHWC
    N, H, W, Cin = x.shape
    Cout = params["w1"].shape[0]
    cp = _round_up(Cout, LANE)                                      # lane-dense channel pad
    stride1 = 2 if downsample else 1
    x_bf = x.astype(jnp.bfloat16)                                   # bf16 matmul operands

    # --- conv1: conv3x3(stride1) + BN + ReLU (two passes, bf16 intermediates) ---
    y1, sc1, sh1, tm1, m1, (N1, Ho, Wo) = _conv_bn(
        x_bf, params["w1"], params["b1"], params["g1"], params["be1"], stride1, cp, cfg)
    y1 = _bn_relu_apply(y1, sc1, sh1, tm1, jnp.bfloat16, cfg)       # bf16 out, fused cast
    y1_nhwc = y1[:m1, :Cout].reshape(N1, Ho, Wo, Cout)

    # --- conv2 pass 1: conv3x3(stride=1) + BN statistics ---
    y2, sc2, sh2, tm2, m2, (N2, Ho2, Wo2) = _conv_bn(
        y1_nhwc, params["w2"], params["b2"], params["g2"], params["be2"], 1, cp, cfg)
    m2pad = y2.shape[0]

    # --- conv2 pass 2: BN apply + ReLU, fused with shortcut + add + final ReLU ---
    if downsample:
        xs = x_bf[:, ::2, ::2, :].reshape(m2, Cin)                  # 1x1 stride-2 sampling
        xs = jnp.pad(xs, ((0, m2pad - m2), (0, 0)))
        wsc = jnp.pad(params["w_sc"][:, :, 0, 0].T,
                      ((0, 0), (0, cp - Cout))).astype(jnp.bfloat16)
        out = _bn_relu_apply(y2, sc2, sh2, tm2, jnp.float32, cfg, xs=xs, wsc=wsc)
    else:
        assert Cin == Cout, "identity shortcut requires Cin == Cout"
        res = jnp.pad(x_bf.reshape(m2, Cin), ((0, m2pad - m2), (0, cp - Cout)))
        out = _bn_relu_apply(y2, sc2, sh2, tm2, jnp.float32, cfg, residual=res)

    out = out[:m2, :Cout].reshape(N2, Ho2, Wo2, Cout)
    return jnp.transpose(out, (0, 3, 1, 2))                         # NHWC -> NCHW


# ---------------------------------------------------------------------------
# Pure-JAX reference (mirrors the PyTorch forward, f32 end-to-end)
# ---------------------------------------------------------------------------
def _convset_ref(x, w, b, g, be, stride):
    pad = w.shape[2] // 2
    y = jax.lax.conv_general_dilated(
        x, w, (stride, stride), [(pad, pad), (pad, pad)],
        dimension_numbers=("NCHW", "OIHW", "NCHW"))
    y = y + b.reshape(1, -1, 1, 1)
    mean = y.mean(axis=(0, 2, 3), keepdims=True)
    var = ((y - mean) ** 2).mean(axis=(0, 2, 3), keepdims=True)
    y = (y - mean) * jax.lax.rsqrt(var + EPS) * g.reshape(1, -1, 1, 1) + be.reshape(1, -1, 1, 1)
    return jnp.maximum(y, 0.0)


def resnet_block_simple_ref(x_nchw, params, downsample):
    stride1 = 2 if downsample else 1
    if downsample:
        residual = jax.lax.conv_general_dilated(
            x_nchw, params["w_sc"], (2, 2), [(0, 0), (0, 0)],
            dimension_numbers=("NCHW", "OIHW", "NCHW"))
    else:
        residual = x_nchw
    y = _convset_ref(x_nchw, params["w1"], params["b1"], params["g1"], params["be1"], stride1)
    y = _convset_ref(y, params["w2"], params["b2"], params["g2"], params["be2"], 1)
    return jnp.maximum(y + residual, 0.0)


# ---------------------------------------------------------------------------
def _make_params(key, in_channels, downsample):
    Cout = 2 * in_channels if downsample else in_channels
    ks = jax.random.split(key, 6)
    params = dict(
        w1=0.2 * jax.random.normal(ks[0], (Cout, in_channels, 3, 3), jnp.float32),
        b1=0.1 * jax.random.normal(ks[1], (Cout,), jnp.float32),
        g1=jnp.ones((Cout,), jnp.float32),     # BN gamma init (torch default)
        be1=jnp.zeros((Cout,), jnp.float32),   # BN beta init (torch default)
        w2=0.2 * jax.random.normal(ks[2], (Cout, Cout, 3, 3), jnp.float32),
        b2=0.1 * jax.random.normal(ks[3], (Cout,), jnp.float32),
        g2=jnp.ones((Cout,), jnp.float32),
        be2=jnp.zeros((Cout,), jnp.float32),
    )
    if downsample:
        params["w_sc"] = 0.2 * jax.random.normal(ks[4], (Cout, in_channels, 1, 1), jnp.float32)
    return params, Cout


if __name__ == "__main__":
    key = jax.random.PRNGKey(0)
    kx, kp1, kp2, kx3, kp3 = jax.random.split(key, 5)
    N, Cin, H, W = 2, 4, 16, 16
    x = jax.random.normal(kx, (N, Cin, H, W), jnp.float32)

    # Tolerance accounts for bf16 MXU operands + bf16 internal intermediates
    # (f32 accumulation and f32 BN statistics/math throughout).
    RTOL, ATOL = 3e-2, 5e-2

    # downsample=True: out_channels = 8, stride 2, spatial 16 -> 8, fused projection shortcut
    params_d, Cout_d = _make_params(kp1, Cin, downsample=True)
    out_d = jax.block_until_ready(resnet_block_simple(x, params_d, downsample=True))
    ref_d = resnet_block_simple_ref(x, params_d, downsample=True)
    assert out_d.shape == (N, Cout_d, H // 2, W // 2)
    np.testing.assert_allclose(np.asarray(out_d), np.asarray(ref_d), rtol=RTOL, atol=ATOL)

    # downsample=False: identity shortcut, shapes preserved
    params_i, Cout_i = _make_params(kp2, Cin, downsample=False)
    out_i = jax.block_until_ready(resnet_block_simple(x, params_i, downsample=False))
    ref_i = resnet_block_simple_ref(x, params_i, downsample=False)
    assert out_i.shape == (N, Cout_i, H, W)
    np.testing.assert_allclose(np.asarray(out_i), np.asarray(ref_i), rtol=RTOL, atol=ATOL)

    # Larger odd spatial size: M = 2*23*23 = 1058 -> multiple tiles (with padded
    # trailing tiles), exercising the per-core partial-sum BN reduction and the
    # masked-stats pl.when path.
    x3 = jax.random.normal(kx3, (2, 4, 23, 23), jnp.float32)
    params_3, Cout_3 = _make_params(kp3, 4, downsample=False)
    out_3 = jax.block_until_ready(resnet_block_simple(x3, params_3, downsample=False))
    ref_3 = resnet_block_simple_ref(x3, params_3, downsample=False)
    assert out_3.shape == (2, Cout_3, 23, 23)
    np.testing.assert_allclose(np.asarray(out_3), np.asarray(ref_3), rtol=RTOL, atol=ATOL)

    print("KERNEL_OK")
</pallas_src>

<mosaic_0001>
module attributes {stable_mosaic.version = 11 : i64} {
  func.func @_bn_relu_kernel(%arg0: i32, %arg1: memref<128x128xbf16, #tpu.memory_space<vmem>>, %arg2: memref<1x128xf32, #tpu.memory_space<vmem>>, %arg3: memref<1x128xf32, #tpu.memory_space<vmem>>, %arg4: memref<128x128xbf16, #tpu.memory_space<vmem>>) attributes {dimension_semantics = [#tpu.dimension_semantics<parallel>], iteration_bounds = array<i64: 1>, scalar_prefetch = 0 : i64, scratch_operands = 0 : i64, tpu.core_type = #tpu.core_type<tc>, window_params = [{transform_indices = @transform_0, window_bounds = array<i64: 128, 128>}, {pipeline_mode = #tpu.pipeline_mode<synchronous>, transform_indices = @transform_1, window_bounds = array<i64: 1, 128>}, {pipeline_mode = #tpu.pipeline_mode<synchronous>, transform_indices = @transform_2, window_bounds = array<i64: 1, 128>}, {transform_indices = @transform_3, window_bounds = array<i64: 128, 128>}]} {
    %c0 = arith.constant 0 : index
    %c0_0 = arith.constant 0 : index
    %0 = vector.load %arg1[%c0, %c0_0] : memref<128x128xbf16, #tpu.memory_space<vmem>>, vector<128x128xbf16>
    %c0_1 = arith.constant 0 : index
    %c0_2 = arith.constant 0 : index
    %1 = vector.load %arg2[%c0_1, %c0_2] : memref<1x128xf32, #tpu.memory_space<vmem>>, vector<1x128xf32>
    %2 = arith.extf %0 : vector<128x128xbf16> to vector<128x128xf32>
    %3 = vector.broadcast %1 : vector<1x128xf32> to vector<128x128xf32>
    %4 = arith.mulf %2, %3 : vector<128x128xf32>
    %c0_3 = arith.constant 0 : index
    %c0_4 = arith.constant 0 : index
    %5 = vector.load %arg3[%c0_3, %c0_4] : memref<1x128xf32, #tpu.memory_space<vmem>>, vector<1x128xf32>
    %6 = vector.broadcast %5 : vector<1x128xf32> to vector<128x128xf32>
    %7 = arith.addf %4, %6 : vector<128x128xf32>
    %cst = arith.constant 0.000000e+00 : f32
    %8 = vector.broadcast %cst : f32 to vector<128x128xf32>
    %9 = arith.maximumf %7, %8 : vector<128x128xf32>
    %10 = arith.truncf %9 : vector<128x128xf32> to vector<128x128xbf16>
    %c0_5 = arith.constant 0 : index
    %c0_6 = arith.constant 0 : index
    %11 = vector.load %arg4[%c0_5, %c0_6] : memref<128x128xbf16, #tpu.memory_space<vmem>>, vector<128x128xbf16>
    tpu.vector_store %arg4[%c0_5, %c0_6], %10 {strides = array<i32>} : memref<128x128xbf16, #tpu.memory_space<vmem>>, vector<128x128xbf16>,
    return
  }
  func.func @transform_0(%arg0: i32) -> (i32, i32) {
    %c0_i32 = arith.constant 0 : i32
    %c0_i32_0 = arith.constant 0 : i32
    return %arg0, %c0_i32 : i32, i32
  }
  func.func @transform_1(%arg0: i32) -> (i32, i32) {
    %c0_i32 = arith.constant 0 : i32
    %c0_i32_0 = arith.constant 0 : i32
    %c0_i32_1 = arith.constant 0 : i32
    return %c0_i32, %c0_i32_0 : i32, i32
  }
  func.func @transform_2(%arg0: i32) -> (i32, i32) {
    %c0_i32 = arith.constant 0 : i32
    %c0_i32_0 = arith.constant 0 : i32
    %c0_i32_1 = arith.constant 0 : i32
    return %c0_i32, %c0_i32_0 : i32, i32
  }
  func.func @transform_3(%arg0: i32) -> (i32, i32) {
    %c0_i32 = arith.constant 0 : i32
    %c0_i32_0 = arith.constant 0 : i32
    return %arg0, %c0_i32 : i32, i32
  }
}

module attributes {stable_mosaic.version = 11 : i64} {
  func.func @_conv_stats_kernel(%arg0: i32, %arg1: i32, %arg2: memref<128x128xbf16, #tpu.memory_space<vmem>>, %arg3: memref<128x128xbf16, #tpu.memory_space<vmem>>, %arg4: memref<1x128xf32, #tpu.memory_space<vmem>>, %arg5: memref<128x128xbf16, #tpu.memory_space<vmem>>, %arg6: memref<1x1x128xf32, #tpu.memory_space<vmem>>, %arg7: memref<1x1x128xf32, #tpu.memory_space<vmem>>) attributes {dimension_semantics = [#tpu.dimension_semantics<parallel>, #tpu.dimension_semantics<arbitrary>], iteration_bounds = array<i64: 1, 1>, scalar_prefetch = 0 : i64, scratch_operands = 0 : i64, tpu.core_type = #tpu.core_type<tc>, window_params = [{transform_indices = @transform_0, window_bounds = array<i64: 128, 128>}, {pipeline_mode = #tpu.pipeline_mode<synchronous>, transform_indices = @transform_1, window_bounds = array<i64: 128, 128>}, {pipeline_mode = #tpu.pipeline_mode<synchronous>, transform_indices = @transform_2, window_bounds = array<i64: 1, 128>}, {transform_indices = @transform_3, window_bounds = array<i64: 128, 128>}, {transform_indices = @transform_4, window_bounds = array<i64: 1, 1, 128>}, {transform_indices = @transform_5, window_bounds = array<i64: 1, 1, 128>}]} {
    %c0 = arith.constant 0 : index
    %c0_0 = arith.constant 0 : index
    %0 = vector.load %arg2[%c0, %c0_0] : memref<128x128xbf16, #tpu.memory_space<vmem>>, vector<128x128xbf16>
    %c0_1 = arith.constant 0 : index
    %c0_2 = arith.constant 0 : index
    %1 = vector.load %arg3[%c0_1, %c0_2] : memref<128x128xbf16, #tpu.memory_space<vmem>>, vector<128x128xbf16>
    %cst = arith.constant dense<0.000000e+00> : vector<128x128xf32>
    %2 = tpu.matmul %0, %1, %cst {dimension_numbers = #tpu.dot_dimension_numbers<[1], [0], [0], [1], [0, 0, 1, 1], [], []>} : vector<128x128xbf16>, vector<128x128xbf16>, vector<128x128xf32> -> vector<128x128xf32>
    %c0_3 = arith.constant 0 : index
    %c0_4 = arith.constant 0 : index
    %3 = vector.load %arg4[%c0_3, %c0_4] : memref<1x128xf32, #tpu.memory_space<vmem>>, vector<1x128xf32>
    %4 = vector.broadcast %3 : vector<1x128xf32> to vector<128x128xf32>
    %5 = arith.addf %2, %4 : vector<128x128xf32>
    %6 = arith.truncf %5 : vector<128x128xf32> to vector<128x128xbf16>
    %c0_5 = arith.constant 0 : index
    %c0_6 = arith.constant 0 : index
    %7 = vector.load %arg5[%c0_5, %c0_6] : memref<128x128xbf16, #tpu.memory_space<vmem>>, vector<128x128xbf16>
    tpu.vector_store %arg5[%c0_5, %c0_6], %6 {strides = array<i32>} : memref<128x128xbf16, #tpu.memory_space<vmem>>, vector<128x128xbf16>,
    %c0_i32 = arith.constant 0 : i32
    %8 = arith.cmpi eq, %arg1, %c0_i32 : i32
    %9 = arith.extui %8 : i1 to i32
    %c0_i32_7 = arith.constant 0 : i32
    %10 = arith.cmpi ne, %9, %c0_i32_7 : i32
    scf.if %10 {
      %cst_22 = arith.constant 0.000000e+00 : f32
      %24 = vector.broadcast %cst_22 : f32 to vector<1x1x128xf32>
      %c0_23 = arith.constant 0 : index
      %c0_24 = arith.constant 0 : index
      %c0_25 = arith.constant 0 : index
      %25 = vector.load %arg6[%c0_23, %c0_24, %c0_25] : memref<1x1x128xf32, #tpu.memory_space<vmem>>, vector<1x1x128xf32>
      tpu.vector_store %arg6[%c0_23, %c0_24, %c0_25], %24 {strides = array<i32>} : memref<1x1x128xf32, #tpu.memory_space<vmem>>, vector<1x1x128xf32>,
      %cst_26 = arith.constant 0.000000e+00 : f32
      %26 = vector.broadcast %cst_26 : f32 to vector<1x1x128xf32>
      %c0_27 = arith.constant 0 : index
      %c0_28 = arith.constant 0 : index
      %c0_29 = arith.constant 0 : index
      %27 = vector.load %arg7[%c0_27, %c0_28, %c0_29] : memref<1x1x128xf32, #tpu.memory_space<vmem>>, vector<1x1x128xf32>
      tpu.vector_store %arg7[%c0_27, %c0_28, %c0_29], %26 {strides = array<i32>} : memref<1x1x128xf32, #tpu.memory_space<vmem>>, vector<1x1x128xf32>,
    } else {
    }
    %c0_8 = arith.constant 0 : index
    %c0_9 = arith.constant 0 : index
    %c0_10 = arith.constant 0 : index
    %11 = vector.load %arg6[%c0_8, %c0_9, %c0_10] : memref<1x1x128xf32, #tpu.memory_space<vmem>>, vector<1x1x128xf32>
    %cst_11 = arith.constant dense<0.000000e+00> : vector<128xf32>
    %12 = vector.multi_reduction <add>, %5, %cst_11 [0] : vector<128x128xf32> to vector<128xf32>
    %13 = vector.shape_cast %12 : vector<128xf32> to vector<1x128xf32>
    %14 = vector.shape_cast %13 : vector<1x128xf32> to vector<1x1x128xf32>
    %15 = arith.addf %11, %14 : vector<1x1x128xf32>
    %c0_12 = arith.constant 0 : index
    %c0_13 = arith.constant 0 : index
    %c0_14 = arith.constant 0 : index
    %16 = vector.load %arg6[%c0_12, %c0_13, %c0_14] : memref<1x1x128xf32, #tpu.memory_space<vmem>>, vector<1x1x128xf32>
    tpu.vector_store %arg6[%c0_12, %c0_13, %c0_14], %15 {strides = array<i32>} : memref<1x1x128xf32, #tpu.memory_space<vmem>>, vector<1x1x128xf32>,
    %c0_15 = arith.constant 0 : index
    %c0_16 = arith.constant 0 : index
    %c0_17 = arith.constant 0 : index
    %17 = vector.load %arg7[%c0_15, %c0_16, %c0_17] : memref<1x1x128xf32, #tpu.memory_space<vmem>>, vector<1x1x128xf32>
    %18 = arith.mulf %5, %5 : vector<128x128xf32>
    %cst_18 = arith.constant dense<0.000000e+00> : vector<128xf32>
    %19 = vector.multi_reduction <add>, %18, %cst_18 [0] : vector<128x128xf32> to vector<128xf32>
    %20 = vector.shape_cast %19 : vector<128xf32> to vector<1x128xf32>
    %21 = vector.shape_cast %20 : vector<1x128xf32> to vector<1x1x128xf32>
    %22 = arith.addf %17, %21 : vector<1x1x128xf32>
    %c0_19 = arith.constant 0 : index
    %c0_20 = arith.constant 0 : index
    %c0_21 = arith.constant 0 : index
    %23 = vector.load %arg7[%c0_19, %c0_20, %c0_21] : memref<1x1x128xf32, #tpu.memory_space<vmem>>, vector<1x1x128xf32>
    tpu.vector_store %arg7[%c0_19, %c0_20, %c0_21], %22 {strides = array<i32>} : memref<1x1x128xf32, #tpu.memory_space<vmem>>, vector<1x1x128xf32>,
    return
  }
  func.func @transform_0(%arg0: i32, %arg1: i32) -> (i32, i32) {
    %c1_i32 = arith.constant 1 : i32
    %0 = arith.muli %arg0, %c1_i32 : i32
    %1 = arith.addi %0, %arg1 : i32
    %c0_i32 = arith.constant 0 : i32
    %c0_i32_0 = arith.constant 0 : i32
    return %1, %c0_i32 : i32, i32
  }
  func.func @transform_1(%arg0: i32, %arg1: i32) -> (i32, i32) {
    %c0_i32 = arith.constant 0 : i32
    %c0_i32_0 = arith.constant 0 : i32
    %c0_i32_1 = arith.constant 0 : i32
    return %c0_i32, %c0_i32_0 : i32, i32
  }
  func.func @transform_2(%arg0: i32, %arg1: i32) -> (i32, i32) {
    %c0_i32 = arith.constant 0 : i32
    %c0_i32_0 = arith.constant 0 : i32
    %c0_i32_1 = arith.constant 0 : i32
    return %c0_i32, %c0_i32_0 : i32, i32
  }
  func.func @transform_3(%arg0: i32, %arg1: i32) -> (i32, i32) {
    %c1_i32 = arith.constant 1 : i32
    %0 = arith.muli %arg0, %c1_i32 : i32
    %1 = arith.addi %0, %arg1 : i32
    %c0_i32 = arith.constant 0 : i32
    %c0_i32_0 = arith.constant 0 : i32
    return %1, %c0_i32 : i32, i32
  }
  func.func @transform_4(%arg0: i32, %arg1: i32) -> (i32, i32, i32) {
    %c0_i32 = arith.constant 0 : i32
    %c0_i32_0 = arith.constant 0 : i32
    %c0_i32_1 = arith.constant 0 : i32
    return %arg0, %c0_i32, %c0_i32_0 : i32, i32, i32
  }
  func.func @transform_5(%arg0: i32, %arg1: i32) -> (i32, i32, i32) {
    %c0_i32 = arith.constant 0 : i32
    %c0_i32_0 = arith.constant 0 : i32
    %c0_i32_1 = arith.constant 0 : i32
    return %arg0, %c0_i32, %c0_i32_0 : i32, i32, i32
  }
}

module attributes {stable_mosaic.version = 11 : i64} {
  func.func @_bn_relu_proj_add_relu_kernel(%arg0: i32, %arg1: memref<128x128xbf16, #tpu.memory_space<vmem>>, %arg2: memref<1x128xf32, #tpu.memory_space<vmem>>, %arg3: memref<1x128xf32, #tpu.memory_space<vmem>>, %arg4: memref<128x4xbf16, #tpu.memory_space<vmem>>, %arg5: memref<4x128xbf16, #tpu.memory_space<vmem>>, %arg6: memref<128x128xf32, #tpu.memory_space<vmem>>) attributes {dimension_semantics = [#tpu.dimension_semantics<parallel>], iteration_bounds = array<i64: 1>, scalar_prefetch = 0 : i64, scratch_operands = 0 : i64, tpu.core_type = #tpu.core_type<tc>, window_params = [{transform_indices = @transform_0, window_bounds = array<i64: 128, 128>}, {pipeline_mode = #tpu.pipeline_mode<synchronous>, transform_indices = @transform_1, window_bounds = array<i64: 1, 128>}, {pipeline_mode = #tpu.pipeline_mode<synchronous>, transform_indices = @transform_2, window_bounds = array<i64: 1, 128>}, {transform_indices = @transform_3, window_bounds = array<i64: 128, 4>}, {pipeline_mode = #tpu.pipeline_mode<synchronous>, transform_indices = @transform_4, window_bounds = array<i64: 4, 128>}, {transform_indices = @transform_5, window_bounds = array<i64: 128, 128>}]} {
    %c0 = arith.constant 0 : index
    %c0_0 = arith.constant 0 : index
    %0 = vector.load %arg4[%c0, %c0_0] : memref<128x4xbf16, #tpu.memory_space<vmem>>, vector<128x4xbf16>
    %c0_1 = arith.constant 0 : index
    %c0_2 = arith.constant 0 : index
    %1 = vector.load %arg5[%c0_1, %c0_2] : memref<4x128xbf16, #tpu.memory_space<vmem>>, vector<4x128xbf16>
    %cst = arith.constant dense<0.000000e+00> : vector<128x128xf32>
    %2 = tpu.matmul %0, %1, %cst {dimension_numbers = #tpu.dot_dimension_numbers<[1], [0], [0], [1], [0, 0, 1, 1], [], []>} : vector<128x4xbf16>, vector<4x128xbf16>, vector<128x128xf32> -> vector<128x128xf32>
    %c0_3 = arith.constant 0 : index
    %c0_4 = arith.constant 0 : index
    %3 = vector.load %arg1[%c0_3, %c0_4] : memref<128x128xbf16, #tpu.memory_space<vmem>>, vector<128x128xbf16>
    %c0_5 = arith.constant 0 : index
    %c0_6 = arith.constant 0 : index
    %4 = vector.load %arg2[%c0_5, %c0_6] : memref<1x128xf32, #tpu.memory_space<vmem>>, vector<1x128xf32>
    %5 = arith.extf %3 : vector<128x128xbf16> to vector<128x128xf32>
    %6 = vector.broadcast %4 : vector<1x128xf32> to vector<128x128xf32>
    %7 = arith.mulf %5, %6 : vector<128x128xf32>
    %c0_7 = arith.constant 0 : index
    %c0_8 = arith.constant 0 : index
    %8 = vector.load %arg3[%c0_7, %c0_8] : memref<1x128xf32, #tpu.memory_space<vmem>>, vector<1x128xf32>
    %9 = vector.broadcast %8 : vector<1x128xf32> to vector<128x128xf32>
    %10 = arith.addf %7, %9 : vector<128x128xf32>
    %cst_9 = arith.constant 0.000000e+00 : f32
    %11 = vector.broadcast %cst_9 : f32 to vector<128x128xf32>
    %12 = arith.maximumf %10, %11 : vector<128x128xf32>
    %13 = arith.addf %12, %2 : vector<128x128xf32>
    %cst_10 = arith.constant 0.000000e+00 : f32
    %14 = vector.broadcast %cst_10 : f32 to vector<128x128xf32>
    %15 = arith.maximumf %13, %14 : vector<128x128xf32>
    %c0_11 = arith.constant 0 : index
    %c0_12 = arith.constant 0 : index
    %16 = vector.load %arg6[%c0_11, %c0_12] : memref<128x128xf32, #tpu.memory_space<vmem>>, vector<128x128xf32>
    tpu.vector_store %arg6[%c0_11, %c0_12], %15 {strides = array<i32>} : memref<128x128xf32, #tpu.memory_space<vmem>>, vector<128x128xf32>,
    return
  }
  func.func @transform_0(%arg0: i32) -> (i32, i32) {
    %c0_i32 = arith.constant 0 : i32
    %c0_i32_0 = arith.constant 0 : i32
    return %arg0, %c0_i32 : i32, i32
  }
  func.func @transform_1(%arg0: i32) -> (i32, i32) {
    %c0_i32 = arith.constant 0 : i32
    %c0_i32_0 = arith.constant 0 : i32
    %c0_i32_1 = arith.constant 0 : i32
    return %c0_i32, %c0_i32_0 : i32, i32
  }
  func.func @transform_2(%arg0: i32) -> (i32, i32) {
    %c0_i32 = arith.constant 0 : i32
    %c0_i32_0 = arith.constant 0 : i32
    %c0_i32_1 = arith.constant 0 : i32
    return %c0_i32, %c0_i32_0 : i32, i32
  }
  func.func @transform_3(%arg0: i32) -> (i32, i32) {
    %c0_i32 = arith.constant 0 : i32
    %c0_i32_0 = arith.constant 0 : i32
    return %arg0, %c0_i32 : i32, i32
  }
  func.func @transform_4(%arg0: i32) -> (i32, i32) {
    %c0_i32 = arith.constant 0 : i32
    %c0_i32_0 = arith.constant 0 : i32
    %c0_i32_1 = arith.constant 0 : i32
    return %c0_i32, %c0_i32_0 : i32, i32
  }
  func.func @transform_5(%arg0: i32) -> (i32, i32) {
    %c0_i32 = arith.constant 0 : i32
    %c0_i32_0 = arith.constant 0 : i32
    return %arg0, %c0_i32 : i32, i32
  }
}

</mosaic_0001>

<bundles_post_ra>
// kernel: resnet_block_simple.5
= control target key start
LH: loop header
LB: loop body
LE: loop exit
PB: predicated region body
PF: predicated region fallthrough
CT: control target
= control target key end

     0   :  { %8 = vsyncpa [#allocation3], 0  ;;  %s587_s0 = inlined_call_operand.hbm [shape: bf16[128,128], index: 0, kind: input, shape index: {}]   ;;  %s588_s1 = inlined_call_operand.hbm [shape: f32[1,128], index: 1, kind: input, shape index: {}]   ;;  %s589_s2 = inlined_call_operand.hbm [shape: f32[1,128], index: 2, kind: input, shape index: {}]   ;;  %s590_s3 = inlined_call_operand.hbm [shape: bf16[128,128], index: 3, kind: output, shape index: {}]  }
   0x1   :  { %9 = vsyncpa [#allocation6], 0 }
   0x2   :  { %10 = vsyncpa [#allocation4], 0  ;;  %s464_s12 = smov [#allocation5]   ;;  %s465_s14 = smov [#allocation2]  }
   0x3   :  { %s29_s13 = sshll.u32 %s464_s12, 4  ;;  %s16_s15 = sshll.u32 %s465_s14, 4  ;;  %s30_s13 = int_to_ptr.vmem [resolvable:$true] %s29_s13  ;;  %s490_s15 = int_to_ptr.vmem [resolvable:$true] %s16_s15 }
   0x4   :  { %s370_s18 = scalar_lea.hbm %s588_s1, 16 }
   0x5   :  { %p371_p0 = scmp.ne.s32.totalorder %s588_s1, %s370_s18  ;;  %p374_p1 = scmp.lt.u32.totalorder %s370_s18, %s588_s1 }
   0x7   :  { %p376_p2 = pnand %p374_p1, %p371_p0 }
   0x9   :  { %379 = shalt.err (!%p376_p2)
}
   0xa   :  { %s380_s23 = scalar_lea.vmem %s30_s13, 16  ;;  %s384_s24 = scalar_lea.vmem %s30_s13, 32 }
   0xb   :  { %p381_p3 = scmp.ne.s32.totalorder %s30_s13, %s380_s23  ;;  %p385_p4 = scmp.lt.s32.totalorder %s30_s13, %s30_s13 }
   0xc   :  { %p386_p5 = scmp.lt.s32.totalorder %s384_s24, %s380_s23 }
   0xe   :  { %p387_p6 = por %p386_p5, %p385_p4 }
  0x10   :  { %p388_p7 = pnand %p387_p6, %p381_p3 }
  0x12   :  { %391 = shalt.err (!%p388_p7)
}
  0x13   :  { %32 = dma.hbm_to_vmem [thread:$0]  %s588_s1, 16, %s30_s13, [#allocation6]  }
  0x14   :  { %s392_s29 = scalar_lea.hbm %s587_s0, 1024 }
  0x15   :  { %p393_p8 = scmp.ne.s32.totalorder %s587_s0, %s392_s29  ;;  %p396_p9 = scmp.lt.u32.totalorder %s392_s29, %s587_s0 }
  0x17   :  { %p398_p10 = pnand %p396_p9, %p393_p8 }
  0x19   :  { %401 = shalt.err (!%p398_p10)
}
  0x1a   :  { %s402_s7 = scalar_lea.vmem %s490_s15, 1024  ;;  %p407_p12 = scmp.lt.s32.totalorder %s490_s15, %s490_s15 }
  0x1b   :  { %p403_p11 = scmp.ne.s32.totalorder %s490_s15, %s402_s7  ;;  %p408_p13 = scmp.lt.s32.totalorder %s402_s7, %s402_s7 }
  0x1d   :  { %p409_p0 = por %p408_p13, %p407_p12 }
  0x1f   :  { %p410_p1 = pnand %p409_p0, %p403_p11 }
  0x21   :  { %413 = shalt.err (!%p410_p1)
}
  0x22   :  { %s466_s1 = smov 64   ;;  %s467_s8 = smov 4  }
  0x23   :  { %22 = dma.hbm_to_vmem [thread:$0]  %s587_s0, 1024, %s490_s15, [#allocation3], %s466_s1, %s466_s1, %s467_s8  }
  0x24   :  { %s468_s11 = smov [#allocation7]   ;;  %s414_s16 = scalar_lea.hbm %s589_s2, 16 }
  0x25   :  { %s39_s12 = sshll.u32 %s468_s11, 4  ;;  %p415_p2 = scmp.ne.s32.totalorder %s589_s2, %s414_s16  ;;  %s40_s12 = int_to_ptr.vmem [resolvable:$true] %s39_s12 }
  0x26   :  { %p418_p3 = scmp.lt.u32.totalorder %s414_s16, %s589_s2 }
  0x28   :  { %p420_p4 = pnand %p418_p3, %p415_p2 }
  0x2a   :  { %423 = shalt.err (!%p420_p4)
}
  0x2b   :  { %s424_s21 = scalar_lea.vmem %s40_s12, 16  ;;  %s428_s0 = scalar_lea.vmem %s40_s12, 32 }
  0x2c   :  { %p425_p5 = scmp.ne.s32.totalorder %s40_s12, %s424_s21  ;;  %p429_p6 = scmp.lt.s32.totalorder %s40_s12, %s40_s12 }
  0x2d   :  { %p430_p7 = scmp.lt.s32.totalorder %s428_s0, %s424_s21 }
  0x2f   :  { %p431_p8 = por %p430_p7, %p429_p6 }
  0x31   :  { %p432_p9 = pnand %p431_p8, %p425_p5 }
  0x33   :  { %435 = shalt.err (!%p432_p9)
}
  0x34   :  { %42 = dma.hbm_to_vmem [thread:$0]  %s589_s2, 16, %s40_s12, [#allocation6]  }
  0x35   :  { %458 = dma.done.wait [#allocation3], 1024  }
  0x36   :  { %459 = vsyncadd [#allocation3], 4294966272 }
  0x37   :  { %460 = dma.done.wait [#allocation6], 32  }
  0x38   :  { %461 = vsyncadd [#allocation6], 4294967264  ;;  %v279_v0 = vld [vmem:[#allocation2] sm:$0xff]   ;;  %v350_v4 = vld [vmem:[#allocation2 + $0x8] sm:$0xff]   ;;  %s469_s2 = smov [#allocation8]  }
  0x39   :  { %v536_v1 = vld [vmem:[#allocation5] ss:$0 sm:$0xff]  ;;  %v280_v2 = vunpack.c.l.bf16 %v279_v0  ;;  %v281_v3 = vunpack.c.h.bf16 %v279_v0  ;;  %v351_v5 = vld [vmem:[#allocation2 + $0x10] sm:$0xff]   ;;  %v352_v6 = vld [vmem:[#allocation2 + $0x18] sm:$0xff]   ;;  %v284_v8 = vunpack.c.l.bf16 %v350_v4  ;;  %v285_v9 = vunpack.c.h.bf16 %v350_v4  ;;  %s231_s23 = sshll.u32 %s469_s2, 4  ;;  %s232_s23 = int_to_ptr.vmem [resolvable:$true] %s231_s23 }
  0x3a   :  { %v538_v7 = vld [vmem:[#allocation7] ss:$0 sm:$0xff]  ;;  %v288_v10 = vunpack.c.l.bf16 %v351_v5  ;;  %v289_v11 = vunpack.c.h.bf16 %v351_v5  ;;  %v292_v14 = vunpack.c.l.bf16 %v352_v6  ;;  %v293_v15 = vunpack.c.h.bf16 %v352_v6  ;;  %v354_v33 = vld [vmem:[#allocation2 + $0x28] sm:$0xff]   ;;  %v355_v38 = vld [vmem:[#allocation2 + $0x30] sm:$0xff]   ;;  %s436_s24 = scalar_lea.vmem %s232_s23, 1024  ;;  %p441_p11 = scmp.lt.s32.totalorder %s232_s23, %s232_s23 }
  0x3b   :  { %v91_v12 = vmul.f32 %v280_v2, %v536_v1  ;;  %v92_v13 = vmul.f32 %v281_v3, %v536_v1  ;;  %v93_v16 = vmul.f32 %v284_v8, %v536_v1  ;;  %v94_v17 = vmul.f32 %v285_v9, %v536_v1  ;;  %v353_v28 = vld [vmem:[#allocation2 + $0x20] sm:$0xff]   ;;  %v356_v43 = vld [vmem:[#allocation2 + $0x38] sm:$0xff]   ;;  %p437_p10 = scmp.ne.s32.totalorder %s232_s23, %s436_s24  ;;  %p442_p12 = scmp.lt.s32.totalorder %s436_s24, %s436_s24 }
  0x3c   :  { %v95_v18 = vmul.f32 %v288_v10, %v536_v1  ;;  %v96_v19 = vmul.f32 %v289_v11, %v536_v1  ;;  %v97_v22 = vmul.f32 %v292_v14, %v536_v1  ;;  %v98_v23 = vmul.f32 %v293_v15, %v536_v1 }
  0x3d   :  { %v114_v20 = vadd.f32 %v538_v7, %v91_v12  ;;  %v115_v21 = vadd.f32 %v538_v7, %v92_v13  ;;  %v116_v24 = vadd.f32 %v538_v7, %v93_v16  ;;  %v117_v25 = vadd.f32 %v538_v7, %v94_v17  ;;  %p443_p13 = por %p442_p12, %p441_p11 }
  0x3e   :  { %v118_v26 = vadd.f32 %v538_v7, %v95_v18  ;;  %v119_v27 = vadd.f32 %v538_v7, %v96_v19  ;;  %v120_v31 = vadd.f32 %v538_v7, %v97_v22  ;;  %v121_v32 = vadd.f32 %v538_v7, %v98_v23 }
  0x3f   :  { %v130_v29 = vmax.f32 %v114_v20, 0.0  ;;  %v131_v30 = vmax.f32 %v115_v21, 0.0  ;;  %v132_v34 = vmax.f32 %v116_v24, 0.0  ;;  %v133_v35 = vmax.f32 %v117_v25, 0.0  ;;  %p444_p0 = pnand %p443_p13, %p437_p10 }
  0x40   :  { %v134_v36 = vmax.f32 %v118_v26, 0.0  ;;  %v135_v37 = vmax.f32 %v119_v27, 0.0  ;;  %v136_v40 = vmax.f32 %v120_v31, 0.0  ;;  %v137_v41 = vmax.f32 %v121_v32, 0.0 }
  0x41   :  { %v313_v39 = vpack.c.bf16 %v131_v30, %v130_v29  ;;  %v296_v42 = vunpack.c.l.bf16 %v353_v28  ;;  %v318_v44 = vpack.c.bf16 %v133_v35, %v132_v34  ;;  %v297_v46 = vunpack.c.h.bf16 %v353_v28 }
  0x42   :  { %v323_v45 = vpack.c.bf16 %v135_v37, %v134_v36  ;;  %v300_v47 = vunpack.c.l.bf16 %v354_v33  ;;  %v328_v48 = vpack.c.bf16 %v137_v41, %v136_v40  ;;  %v301_v50 = vunpack.c.h.bf16 %v354_v33 }
  0x43   :  { %314 = vst [vmem:[#allocation8] sm:$0xff] %v313_v39   ;;  %v99_v49 = vmul.f32 %v296_v42, %v536_v1  ;;  %v304_v51 = vunpack.c.l.bf16 %v355_v38  ;;  %357 = vst [vmem:[#allocation8 + $0x8] sm:$0xff] %v318_v44   ;;  %v100_v52 = vmul.f32 %v297_v46, %v536_v1  ;;  %v305_v54 = vunpack.c.h.bf16 %v355_v38 }
  0x44   :  { %358 = vst [vmem:[#allocation8 + $0x10] sm:$0xff] %v323_v45   ;;  %v101_v53 = vmul.f32 %v300_v47, %v536_v1  ;;  %v308_v55 = vunpack.c.l.bf16 %v356_v43  ;;  %359 = vst [vmem:[#allocation8 + $0x18] sm:$0xff] %v328_v48   ;;  %v102_v57 = vmul.f32 %v301_v50, %v536_v1  ;;  %v309_v59 = vunpack.c.h.bf16 %v356_v43 }
  0x45   :  { %v122_v56 = vadd.f32 %v538_v7, %v99_v49  ;;  %v103_v58 = vmul.f32 %v304_v51, %v536_v1  ;;  %v123_v60 = vadd.f32 %v538_v7, %v100_v52  ;;  %v104_v62 = vmul.f32 %v305_v54, %v536_v1 }
  0x46   :  { %v124_v61 = vadd.f32 %v538_v7, %v101_v53  ;;  %v105_v63 = vmul.f32 %v308_v55, %v536_v1  ;;  %v125_v2 = vadd.f32 %v538_v7, %v102_v57  ;;  %v106_v4 = vmul.f32 %v309_v59, %v536_v1 }
  0x47   :  { %v138_v0 = vmax.f32 %v122_v56, 0.0  ;;  %v126_v3 = vadd.f32 %v538_v7, %v103_v58  ;;  %v139_v5 = vmax.f32 %v123_v60, 0.0  ;;  %v127_v8 = vadd.f32 %v538_v7, %v104_v62 }
  0x48   :  { %v140_v6 = vmax.f32 %v124_v61, 0.0  ;;  %v128_v9 = vadd.f32 %v538_v7, %v105_v63  ;;  %v141_v10 = vmax.f32 %v125_v2, 0.0  ;;  %v129_v12 = vadd.f32 %v538_v7, %v106_v4 }
  0x49   :  { %v142_v11 = vmax.f32 %v126_v3, 0.0  ;;  %v333_v13 = vpack.c.bf16 %v139_v5, %v138_v0  ;;  %v143_v14 = vmax.f32 %v127_v8, 0.0 }
  0x4a   :  { %v144_v15 = vmax.f32 %v128_v9, 0.0  ;;  %v338_v16 = vpack.c.bf16 %v141_v10, %v140_v6  ;;  %v145_v17 = vmax.f32 %v129_v12, 0.0 }
  0x4b   :  { %360 = vst [vmem:[#allocation8 + $0x20] sm:$0xff] %v333_v13   ;;  %v343_v18 = vpack.c.bf16 %v143_v14, %v142_v11 }
  0x4c   :  { %361 = vst [vmem:[#allocation8 + $0x28] sm:$0xff] %v338_v16   ;;  %v348_v1 = vpack.c.bf16 %v145_v17, %v144_v15 }
  0x4d   :  { %362 = vst [vmem:[#allocation8 + $0x30] sm:$0xff] %v343_v18  }
  0x4e   :  { %363 = vst [vmem:[#allocation8 + $0x38] sm:$0xff] %v348_v1  }
  0x4f   :  { %447 = shalt.err (!%p444_p0)
}
  0x50   :  { %s448_s27 = scalar_lea.hbm %s590_s3, 1024 }
  0x51   :  { %p449_p1 = scmp.ne.s32.totalorder %s590_s3, %s448_s27  ;;  %p452_p2 = scmp.lt.u32.totalorder %s448_s27, %s590_s3 }
  0x53   :  { %p454_p3 = pnand %p452_p2, %p449_p1 }
  0x55   :  { %457 = shalt.err (!%p454_p3)
}
  0x56   :  { %237 = dma.vmem_to_hbm [thread:$0]  %s232_s23, 1024, %s590_s3, [#allocation4], %s466_s1, %s466_s1, %s467_s8  }
  0x57   :  { %462 = dma.done.wait [#allocation4], 1024  }
  0x58   :  { %463 = vsyncadd [#allocation4], 4294966272 }
  0x59   :  { %241 = vsyncpa [#allocation3], 1 }
  0x5a   :  { %242 = vsyncpa [#allocation6], 1 }
  0x5b   :  { %243 = vsyncpa [#allocation4], 1 }

// kernel: resnet_block_simple.4
= control target key start
LH: loop header
LB: loop body
LE: loop exit
PB: predicated region body
PF: predicated region fallthrough
CT: control target
= control target key end

     0   :  { %11 = vsyncpa [#allocation3], 0  ;;  %s994_s0 = inlined_call_operand.hbm [shape: bf16[128,128], index: 0, kind: input, shape index: {}]   ;;  %s995_s1 = inlined_call_operand.hbm [shape: bf16[128,128], index: 1, kind: input, shape index: {}]   ;;  %s996_s2 = inlined_call_operand.hbm [shape: f32[1,128], index: 2, kind: input, shape index: {}]   ;;  %s997_s3 = inlined_call_operand.hbm [shape: bf16[128,128], index: 3, kind: output, shape index: {0}]   ;;  %s998_s4 = inlined_call_operand.hbm [shape: f32[1,1,128], index: 4, kind: output, shape index: {1}]   ;;  %s999_s5 = inlined_call_operand.hbm [shape: f32[1,1,128], index: 5, kind: output, shape index: {2}]  }
   0x1   :  { %12 = vsyncpa [#allocation6], 0 }
   0x2   :  { %13 = vsyncpa [#allocation4], 0 }
   0x3   :  { %14 = vsyncpa [#allocation10], 0  ;;  %s823_s18 = smov [#allocation5]   ;;  %s824_s20 = smov [#allocation2]  }
   0x4   :  { %s36_s19 = sshll.u32 %s823_s18, 4  ;;  %s24_s21 = sshll.u32 %s824_s20, 4  ;;  %s37_s19 = int_to_ptr.vmem [resolvable:$true] %s36_s19  ;;  %s862_s21 = int_to_ptr.vmem [resolvable:$true] %s24_s21 }
   0x5   :  { %s683_s24 = scalar_lea.hbm %s995_s1, 1024 }
   0x6   :  { %p684_p0 = scmp.ne.s32.totalorder %s995_s1, %s683_s24  ;;  %p687_p1 = scmp.lt.u32.totalorder %s683_s24, %s995_s1 }
   0x8   :  { %p689_p2 = pnand %p687_p1, %p684_p0 }
   0xa   :  { %692 = shalt.err (!%p689_p2)
}
   0xb   :  { %s693_s29 = scalar_lea.vmem %s37_s19, 1024  ;;  %p698_p4 = scmp.lt.s32.totalorder %s37_s19, %s37_s19 }
   0xc   :  { %p694_p3 = scmp.ne.s32.totalorder %s37_s19, %s693_s29  ;;  %p699_p5 = scmp.lt.s32.totalorder %s693_s29, %s693_s29 }
   0xe   :  { %p700_p6 = por %p699_p5, %p698_p4 }
  0x10   :  { %p701_p7 = pnand %p700_p6, %p694_p3 }
  0x12   :  { %704 = shalt.err (!%p701_p7)
}
  0x13   :  { %s825_s30 = smov 64   ;;  %s826_s6 = smov 4  }
  0x14   :  { %42 = dma.hbm_to_vmem [thread:$0]  %s995_s1, 1024, %s37_s19, [#allocation6], %s825_s30, %s825_s30, %s826_s6  }
  0x15   :  { %s705_s11 = scalar_lea.hbm %s994_s0, 1024 }
  0x16   :  { %p706_p8 = scmp.ne.s32.totalorder %s994_s0, %s705_s11  ;;  %p709_p9 = scmp.lt.u32.totalorder %s705_s11, %s994_s0 }
  0x18   :  { %p711_p10 = pnand %p709_p9, %p706_p8 }
  0x1a   :  { %714 = shalt.err (!%p711_p10)
}
  0x1b   :  { %s715_s16 = scalar_lea.vmem %s862_s21, 1024  ;;  %p720_p12 = scmp.lt.s32.totalorder %s862_s21, %s862_s21 }
  0x1c   :  { %p716_p11 = scmp.ne.s32.totalorder %s862_s21, %s715_s16  ;;  %p721_p13 = scmp.lt.s32.totalorder %s715_s16, %s715_s16 }
  0x1e   :  { %p722_p0 = por %p721_p13, %p720_p12 }
  0x20   :  { %p723_p1 = pnand %p722_p0, %p716_p11 }
  0x22   :  { %726 = shalt.err (!%p723_p1)
}
  0x23   :  { %30 = dma.hbm_to_vmem [thread:$0]  %s994_s0, 1024, %s862_s21, [#allocation3], %s825_s30, %s825_s30, %s826_s6  }
  0x24   :  { %s827_s18 = smov [#allocation7]   ;;  %s727_s23 = scalar_lea.hbm %s996_s2, 16 }
  0x25   :  { %s49_s19 = sshll.u32 %s827_s18, 4  ;;  %p728_p2 = scmp.ne.s32.totalorder %s996_s2, %s727_s23  ;;  %s50_s19 = int_to_ptr.vmem [resolvable:$true] %s49_s19 }
  0x26   :  { %p731_p3 = scmp.lt.u32.totalorder %s727_s23, %s996_s2 }
  0x28   :  { %p733_p4 = pnand %p731_p3, %p728_p2 }
  0x2a   :  { %736 = shalt.err (!%p733_p4)
}
  0x2b   :  { %s737_s28 = scalar_lea.vmem %s50_s19, 16  ;;  %s741_s0 = scalar_lea.vmem %s50_s19, 32 }
  0x2c   :  { %p738_p5 = scmp.ne.s32.totalorder %s50_s19, %s737_s28  ;;  %p742_p6 = scmp.lt.s32.totalorder %s50_s19, %s50_s19 }
  0x2d   :  { %p743_p7 = scmp.lt.s32.totalorder %s741_s0, %s737_s28 }
  0x2f   :  { %p744_p8 = por %p743_p7, %p742_p6 }
  0x31   :  { %p745_p9 = pnand %p744_p8, %p738_p5 }
  0x33   :  { %748 = shalt.err (!%p745_p9)
}
  0x34   :  { %52 = dma.hbm_to_vmem [thread:$0]  %s996_s2, 16, %s50_s19, [#allocation6]  }
  0x35   :  { %815 = dma.done.wait [#allocation3], 1024  }
  0x36   :  { %816 = vsyncadd [#allocation3], 4294966272 }
  0x37   :  { %817 = dma.done.wait [#allocation6], 1040  }
  0x38   :  { %818 = vsyncadd [#allocation6], 4294966256  ;;  %v667_v0 = vld [vmem:[#allocation5] sm:$0xff]   ;;  %v668_v1 = vld [vmem:[#allocation5 + $0x8] sm:$0xff]   ;;  %v828_v16 = vmov 0.0   ;;  %s829_s2 = smov [#allocation8]  }
  0x39   :  { %610 = vmatprep.subr.bf16.mxu0 %v667_v0  ;;  %642 = vmatprep.subr.bf16.mxu1 %v667_v0  ;;  %v669_v2 = vld [vmem:[#allocation5 + $0x10] sm:$0xff]   ;;  %v670_v3 = vld [vmem:[#allocation5 + $0x18] sm:$0xff]   ;;  %v675_v4 = vld [vmem:[#allocation2] sm:$0xff]   ;;  %383 = vst [vmem:[#allocation9] sm:$0x1] %v828_v16  ;;  %s458_s7 = sshll.u32 %s829_s2, 4  ;;  %s459_s7 = int_to_ptr.vmem [resolvable:$true] %s458_s7 }
  0x3a   :  { %611 = vmatpush3.bf16.msra.mxu0 %v667_v0  ;;  %650 = vmatpush3.bf16.msra.mxu1 %v667_v0  ;;  %v671_v5 = vld [vmem:[#allocation5 + $0x20] sm:$0xff]   ;;  %v672_v7 = vld [vmem:[#allocation5 + $0x28] sm:$0xff]   ;;  %v673_v8 = vld [vmem:[#allocation5 + $0x30] sm:$0xff]   ;;  %384 = vst [vmem:[#allocation11] sm:$0x1] %v828_v16  ;;  %s749_s8 = scalar_lea.vmem %s459_s7, 1024  ;;  %p754_p11 = scmp.lt.s32.totalorder %s459_s7, %s459_s7 }
  0x3b   :  { %612 = vmatprep.subr.bf16.mxu0 %v668_v1  ;;  %643 = vmatprep.subr.bf16.mxu1 %v668_v1  ;;  %v679_v6 = vld [vmem:[#allocation2 + $0x20] sm:$0xff]   ;;  %v674_v9 = vld [vmem:[#allocation5 + $0x38] sm:$0xff]   ;;  %v676_v10 = vld [vmem:[#allocation2 + $0x8] sm:$0xff]   ;;  %p750_p10 = scmp.ne.s32.totalorder %s459_s7, %s749_s8  ;;  %p755_p12 = scmp.lt.s32.totalorder %s749_s8, %s749_s8 }
  0x3c   :  { %626 = vmatprep.mubr.bf16.mxu0 %v675_v4  ;;  %634 = vmatprep.mubr.bf16.mxu1 %v679_v6  ;;  %v680_v11 = vld [vmem:[#allocation2 + $0x28] sm:$0xff]   ;;  %v677_v12 = vld [vmem:[#allocation2 + $0x10] sm:$0xff]   ;;  %v678_v14 = vld [vmem:[#allocation2 + $0x18] sm:$0xff]  }
  0x3d   :  { %v681_v13 = vld [vmem:[#allocation2 + $0x30] sm:$0xff]   ;;  %v682_v15 = vld [vmem:[#allocation2 + $0x38] sm:$0xff]   ;;  %v498_v17 = vld [vmem:[#allocation7] ss:$0 sm:$0xff]  ;;  %p756_p13 = por %p755_p12, %p754_p11 }
  0x3e   :  { %613 = vmatpush3.bf16.msra.mxu0 %v668_v1  ;;  %651 = vmatpush3.bf16.msra.mxu1 %v668_v1 }
  0x3f   :  { %614 = vmatprep.subr.bf16.mxu0 %v669_v2  ;;  %644 = vmatprep.subr.bf16.mxu1 %v669_v2  ;;  %p757_p0 = pnand %p756_p13, %p750_p10 }
  0x42   :  { %615 = vmatpush3.bf16.msra.mxu0 %v669_v2  ;;  %652 = vmatpush3.bf16.msra.mxu1 %v669_v2 }
  0x43   :  { %616 = vmatprep.subr.bf16.mxu0 %v670_v3  ;;  %645 = vmatprep.subr.bf16.mxu1 %v670_v3 }
  0x46   :  { %617 = vmatpush3.bf16.msra.mxu0 %v670_v3  ;;  %653 = vmatpush3.bf16.msra.mxu1 %v670_v3 }
  0x47   :  { %618 = vmatprep.subr.bf16.mxu0 %v671_v5  ;;  %646 = vmatprep.subr.bf16.mxu1 %v671_v5 }
  0x4a   :  { %619 = vmatpush3.bf16.msra.mxu0 %v671_v5  ;;  %654 = vmatpush3.bf16.msra.mxu1 %v671_v5 }
  0x4b   :  { %620 = vmatprep.subr.bf16.mxu0 %v672_v7  ;;  %647 = vmatprep.subr.bf16.mxu1 %v672_v7 }
  0x4e   :  { %621 = vmatpush3.bf16.msra.mxu0 %v672_v7  ;;  %655 = vmatpush3.bf16.msra.mxu1 %v672_v7 }
  0x4f   :  { %622 = vmatprep.subr.bf16.mxu0 %v673_v8  ;;  %648 = vmatprep.subr.bf16.mxu1 %v673_v8 }
  0x52   :  { %623 = vmatpush3.bf16.msra.mxu0 %v673_v8  ;;  %656 = vmatpush3.bf16.msra.mxu1 %v673_v8 }
  0x53   :  { %624 = vmatprep.subr.bf16.mxu0 %v674_v9  ;;  %649 = vmatprep.subr.bf16.mxu1 %v674_v9 }
  0x56   :  { %625 = vmatpush3.bf16.msra.mxu0 %v674_v9  ;;  %657 = vmatpush3.bf16.msra.mxu1 %v674_v9 }
  0x59   :  { %627 = vmatmul.mubr.bf16.vlgmr.msra.gmra.mrb[0].mxu0 %v676_v10  ;;  %635 = vmatmul.mubr.bf16.vlgmr.msra.gmra.mrb[0].mxu1 %v680_v11 }
  0x5a   :  { %630 = vmatprep.mubr.bf16.mxu0 %v677_v12  ;;  %638 = vmatprep.mubr.bf16.mxu1 %v681_v13 }
  0x61   :  { %631 = vmatmul.mubr.bf16.gmra.mrb[4].mxu0 %v678_v14  ;;  %639 = vmatmul.mubr.bf16.gmra.mrb[4].mxu1 %v682_v15 }
 0x12c   :  { %v628_v18 = vpop.f32.mrb[0].mxu0  ;;  %v636_v19 = vpop.f32.mrb[0].mxu1 }
 0x12d   :  { %v236_v20 = vpop.f32.mrb[1].mxu0  ;;  %v911_v21 = vadd.f32 %v636_v19, %v498_v17  ;;  %v268_v22 = vpop.f32.mrb[1].mxu1  ;;  %v245_v27 = vadd.f32 %v628_v18, %v498_v17 }
 0x12e   :  { %v237_v23 = vadd.f32 %v498_v17, %v236_v20  ;;  %v629_v24 = vpop.f32.mrb[2].mxu0  ;;  %v913_v25 = vadd.f32 %v498_v17, %v268_v22  ;;  %v637_v26 = vpop.f32.mrb[2].mxu1 }
 0x12f   :  { %v248_v28 = vadd.f32 %v629_v24, %v498_v17  ;;  %v239_v29 = vpop.f32.mrb[3].mxu0  ;;  %v915_v30 = vadd.f32 %v637_v26, %v498_v17  ;;  %v271_v31 = vpop.f32.mrb[3].mxu1  ;;  %v412_v41 = vmul.f32 %v245_v27, %v245_v27 }
 0x130   :  { %v240_v32 = vadd.f32 %v498_v17, %v239_v29  ;;  %v917_v33 = vadd.f32 %v498_v17, %v271_v31  ;;  %v410_v34 = vmul.f32 %v237_v23, %v237_v23  ;;  %v418_v15 = vmul.f32 %v913_v25, %v913_v25 }
 0x131   :  { %v555_v35 = vpack.c.bf16 %v248_v28, %v245_v27  ;;  %v575_v36 = vpack.c.bf16 %v915_v30, %v911_v21  ;;  %v413_v49 = vmul.f32 %v248_v28, %v248_v28 }
 0x132   :  { %v550_v37 = vpack.c.bf16 %v240_v32, %v237_v23  ;;  %v386_v38 = vadd.f32 %v240_v32, %v237_v23  ;;  %v411_v39 = vmul.f32 %v240_v32, %v240_v32  ;;  %v570_v40 = vpack.c.bf16 %v917_v33, %v913_v25 }
 0x133   :  { %587 = vst [vmem:[#allocation8 + $0x8] sm:$0xff] %v555_v35   ;;  %591 = vst [vmem:[#allocation8 + $0x28] sm:$0xff] %v575_v36  }
 0x134   :  { %551 = vst [vmem:[#allocation8] sm:$0xff] %v550_v37   ;;  %v387_v42 = vadd.f32 %v386_v38, %v245_v27  ;;  %v426_v43 = vadd.f32 %v411_v39, %v410_v34  ;;  %v632_v44 = vpop.f32.mrb[4].mxu0  ;;  %590 = vst [vmem:[#allocation8 + $0x20] sm:$0xff] %v570_v40   ;;  %v640_v45 = vpop.f32.mrb[4].mxu1 }
 0x135   :  { %v252_v46 = vpop.f32.mrb[5].mxu0  ;;  %v923_v47 = vadd.f32 %v640_v45, %v498_v17  ;;  %v284_v48 = vpop.f32.mrb[5].mxu1  ;;  %v261_v55 = vadd.f32 %v632_v44, %v498_v17 }
 0x136   :  { %v427_v50 = vadd.f32 %v426_v43, %v412_v41  ;;  %v253_v51 = vadd.f32 %v498_v17, %v252_v46  ;;  %v388_v52 = vadd.f32 %v387_v42, %v248_v28  ;;  %v633_v53 = vpop.f32.mrb[6].mxu0  ;;  %v641_v54 = vpop.f32.mrb[6].mxu1  ;;  %v285_v1 = vadd.f32 %v498_v17, %v284_v48 }
 0x137   :  { %v264_v56 = vadd.f32 %v633_v53, %v498_v17  ;;  %v255_v57 = vpop.f32.mrb[7].mxu0  ;;  %v925_v58 = vadd.f32 %v641_v54, %v498_v17  ;;  %v287_v59 = vpop.f32.mrb[7].mxu1  ;;  %v416_v8 = vmul.f32 %v261_v55, %v261_v55 }
 0x138   :  { %v389_v60 = vadd.f32 %v388_v52, %v253_v51  ;;  %v414_v61 = vmul.f32 %v253_v51, %v253_v51  ;;  %v428_v62 = vadd.f32 %v427_v50, %v413_v49  ;;  %v256_v63 = vadd.f32 %v498_v17, %v255_v57 }
 0x139   :  { %v565_v0 = vpack.c.bf16 %v264_v56, %v261_v55  ;;  %v585_v2 = vpack.c.bf16 %v925_v58, %v923_v47  ;;  %v288_v7 = vadd.f32 %v498_v17, %v287_v59  ;;  %v417_v12 = vmul.f32 %v264_v56, %v264_v56 }
 0x13a   :  { %v429_v3 = vadd.f32 %v428_v62, %v414_v61  ;;  %v560_v4 = vpack.c.bf16 %v256_v63, %v253_v51  ;;  %v390_v5 = vadd.f32 %v389_v60, %v256_v63  ;;  %v415_v6 = vmul.f32 %v256_v63, %v256_v63 }
 0x13b   :  { %589 = vst [vmem:[#allocation8 + $0x18] sm:$0xff] %v565_v0   ;;  %593 = vst [vmem:[#allocation8 + $0x38] sm:$0xff] %v585_v2   ;;  %v580_v11 = vpack.c.bf16 %v288_v7, %v285_v1 }
 0x13c   :  { %588 = vst [vmem:[#allocation8 + $0x10] sm:$0xff] %v560_v4   ;;  %v391_v9 = vadd.f32 %v390_v5, %v261_v55  ;;  %v430_v10 = vadd.f32 %v429_v3, %v415_v6 }
 0x13d   :  { %592 = vst [vmem:[#allocation8 + $0x30] sm:$0xff] %v580_v11  }
 0x13e   :  { %v431_v13 = vadd.f32 %v430_v10, %v416_v8  ;;  %v392_v14 = vadd.f32 %v391_v9, %v264_v56 }
 0x140   :  { %v393_v16 = vadd.f32 %v392_v14, %v913_v25  ;;  %v432_v18 = vadd.f32 %v431_v13, %v417_v12 }
 0x141   :  { %760 = shalt.err (!%p757_p0)
}
 0x142   :  { %s761_s11 = scalar_lea.hbm %s997_s3, 1024 }
 0x143   :  { %p762_p1 = scmp.ne.s32.totalorder %s997_s3, %s761_s11  ;;  %p765_p2 = scmp.lt.u32.totalorder %s761_s11, %s997_s3 }
 0x145   :  { %p767_p3 = pnand %p765_p2, %p762_p1 }
 0x147   :  { %770 = shalt.err (!%p767_p3)
}
 0x148   :  { %464 = dma.vmem_to_hbm [thread:$0]  %s459_s7, 1024, %s997_s3, [#allocation4], %s825_s30, %s825_s30, %s826_s6   ;;  %v433_v17 = vadd.f32 %v432_v18, %v418_v15  ;;  %v394_v19 = vadd.f32 %v393_v16, %v917_v33  ;;  %v419_v20 = vmul.f32 %v917_v33, %v917_v33  ;;  %v420_v22 = vmul.f32 %v911_v21, %v911_v21  ;;  %v385_v50 = vld [vmem:[#allocation9] sm:$0x1]  ;;  %v409_v52 = vld [vmem:[#allocation11] sm:$0x1] }
 0x149   :  { %v421_v25 = vmul.f32 %v915_v30, %v915_v30  ;;  %v422_v28 = vmul.f32 %v285_v1, %v285_v1  ;;  %v423_v35 = vmul.f32 %v288_v7, %v288_v7  ;;  %v424_v33 = vmul.f32 %v923_v47, %v923_v47  ;;  %s830_s3 = smov [#allocation9]   ;;  %s831_s6 = smov [#allocation11]  }
 0x14a   :  { %v395_v23 = vadd.f32 %v394_v19, %v911_v21  ;;  %v434_v24 = vadd.f32 %v433_v17, %v419_v20  ;;  %v425_v21 = vmul.f32 %v925_v58, %v925_v58  ;;  %s471_s30 = sshll.u32 %s830_s3, 4  ;;  %s481_s17 = sshll.u32 %s831_s6, 4  ;;  %s472_s30 = int_to_ptr.vmem [resolvable:$true] %s471_s30  ;;  %s962_s17 = int_to_ptr.vmem [resolvable:$true] %s481_s17 }
 0x14b   :  { %s771_s18 = scalar_lea.vmem %s472_s30, 16  ;;  %s775_s19 = scalar_lea.vmem %s472_s30, 32 }
 0x14c   :  { %v435_v26 = vadd.f32 %v434_v24, %v420_v22  ;;  %v396_v27 = vadd.f32 %v395_v23, %v915_v30  ;;  %p772_p4 = scmp.ne.s32.totalorder %s472_s30, %s771_s18  ;;  %p776_p5 = scmp.lt.s32.totalorder %s472_s30, %s472_s30 }
 0x14d   :  { %p777_p6 = scmp.lt.s32.totalorder %s775_s19, %s771_s18 }
 0x14e   :  { %v397_v29 = vadd.f32 %v396_v27, %v285_v1  ;;  %v436_v31 = vadd.f32 %v435_v26, %v421_v25 }
 0x14f   :  { %p778_p7 = por %p777_p6, %p776_p5 }
 0x150   :  { %v437_v32 = vadd.f32 %v436_v31, %v422_v28  ;;  %v398_v34 = vadd.f32 %v397_v29, %v288_v7 }
 0x151   :  { %p779_p8 = pnand %p778_p7, %p772_p4 }
 0x152   :  { %v399_v36 = vadd.f32 %v398_v34, %v923_v47  ;;  %v438_v37 = vadd.f32 %v437_v32, %v423_v35 }
 0x154   :  { %v400_v38 = vadd.f32 %v399_v36, %v925_v58  ;;  %v439_v39 = vadd.f32 %v438_v37, %v424_v33 }
 0x156   :  { %v401_v40 = vrot.slane %v400_v38, 4  ;;  %v440_v30 = vadd.f32 %v439_v39, %v425_v21 }
 0x158   :  { %v402_v41 = vadd.f32 %v401_v40, %v400_v38  ;;  %v441_v42 = vrot.slane %v440_v30, 4 }
 0x15a   :  { %v442_v43 = vadd.f32 %v441_v42, %v440_v30  ;;  %v403_v44 = vrot.slane %v402_v41, 2 }
 0x15c   :  { %v404_v45 = vadd.f32 %v403_v44, %v402_v41  ;;  %v443_v46 = vrot.slane %v442_v43, 2 }
 0x15e   :  { %v405_v48 = vrot.slane %v404_v45, 1  ;;  %v444_v49 = vadd.f32 %v443_v46, %v442_v43 }
 0x160   :  { %v406_v47 = vadd.f32 %v405_v48, %v404_v45  ;;  %v445_v51 = vrot.slane %v444_v49, 1 }
 0x162   :  { %v407_v53 = vadd.f32 %v406_v47, %v385_v50  ;;  %v446_v54 = vadd.f32 %v445_v51, %v444_v49 }
 0x164   :  { %408 = vst [vmem:[#allocation9] sm:$0x1] %v407_v53  ;;  %v447_v55 = vadd.f32 %v446_v54, %v409_v52 }
 0x165   :  { %782 = shalt.err (!%p779_p8)
}
 0x166   :  { %s783_s23 = scalar_lea.hbm %s998_s4, 16 }
 0x167   :  { %p784_p9 = scmp.ne.s32.totalorder %s998_s4, %s783_s23  ;;  %p787_p10 = scmp.lt.u32.totalorder %s783_s23, %s998_s4 }
 0x169   :  { %p789_p11 = pnand %p787_p10, %p784_p9 }
 0x16b   :  { %792 = shalt.err (!%p789_p11)
}
 0x16c   :  { %474 = dma.vmem_to_hbm [thread:$0]  %s472_s30, 16, %s998_s4, [#allocation10]   ;;  %448 = vst [vmem:[#allocation11] sm:$0x1] %v447_v55 }
 0x16d   :  { %s793_s21 = scalar_lea.vmem %s962_s17, 16  ;;  %s797_s29 = scalar_lea.vmem %s962_s17, 32 }
 0x16e   :  { %p794_p12 = scmp.ne.s32.totalorder %s962_s17, %s793_s21  ;;  %p798_p13 = scmp.lt.s32.totalorder %s962_s17, %s962_s17 }
 0x16f   :  { %p799_p0 = scmp.lt.s32.totalorder %s797_s29, %s793_s21 }
 0x171   :  { %p800_p1 = por %p799_p0, %p798_p13 }
 0x173   :  { %p801_p2 = pnand %p800_p1, %p794_p12 }
 0x175   :  { %804 = shalt.err (!%p801_p2)
}
 0x176   :  { %s805_s8 = scalar_lea.hbm %s999_s5, 16 }
 0x177   :  { %p806_p3 = scmp.ne.s32.totalorder %s999_s5, %s805_s8  ;;  %p809_p4 = scmp.lt.u32.totalorder %s805_s8, %s999_s5 }
 0x179   :  { %p811_p5 = pnand %p809_p4, %p806_p3 }
 0x17b   :  { %814 = shalt.err (!%p811_p5)
}
 0x17c   :  { %484 = dma.vmem_to_hbm [thread:$0]  %s962_s17, 16, %s999_s5, [#allocation10]  }
 0x17d   :  { %819 = dma.done.wait [#allocation4], 1024  }
 0x17e   :  { %820 = vsyncadd [#allocation4], 4294966272 }
 0x17f   :  { %821 = dma.done.wait [#allocation10], 32  }
 0x180   :  { %822 = vsyncadd [#allocation10], 4294967264 }
 0x181   :  { %494 = vsyncpa [#allocation3], 1 }
 0x182   :  { %495 = vsyncpa [#allocation6], 1 }
 0x183   :  { %496 = vsyncpa [#allocation4], 1 }
 0x184   :  { %497 = vsyncpa [#allocation10], 1 }

// kernel: resnet_block_simple.7
= control target key start
LH: loop header
LB: loop body
LE: loop exit
PB: predicated region body
PF: predicated region fallthrough
CT: control target
= control target key end

     0   :  { %10 = vsyncpa [#allocation3], 0  ;;  %s812_s0 = inlined_call_operand.hbm [shape: bf16[128,128], index: 0, kind: input, shape index: {}]   ;;  %s813_s1 = inlined_call_operand.hbm [shape: f32[1,128], index: 1, kind: input, shape index: {}]   ;;  %s814_s2 = inlined_call_operand.hbm [shape: f32[1,128], index: 2, kind: input, shape index: {}]   ;;  %s815_s3 = inlined_call_operand.hbm [shape: bf16[128,4], index: 3, kind: input, shape index: {}]   ;;  %s816_s4 = inlined_call_operand.hbm [shape: bf16[4,128], index: 4, kind: input, shape index: {}]   ;;  %s817_s5 = inlined_call_operand.hbm [shape: f32[128,128], index: 5, kind: output, shape index: {}]  }
   0x1   :  { %11 = vsyncpa [#allocation6], 0 }
   0x2   :  { %12 = vsyncpa [#allocation9], 0 }
   0x3   :  { %13 = vsyncpa [#allocation4], 0  ;;  %s674_s18 = smov [#allocation5]   ;;  %s534_s22 = scalar_lea.hbm %s813_s1, 16 }
   0x4   :  { %s32_s19 = sshll.u32 %s674_s18, 4  ;;  %p535_p0 = scmp.ne.s32.totalorder %s813_s1, %s534_s22  ;;  %s33_s19 = int_to_ptr.vmem [resolvable:$true] %s32_s19 }
   0x5   :  { %p538_p1 = scmp.lt.u32.totalorder %s534_s22, %s813_s1 }
   0x7   :  { %p540_p2 = pnand %p538_p1, %p535_p0 }
   0x9   :  { %543 = shalt.err (!%p540_p2)
}
   0xa   :  { %s544_s27 = scalar_lea.vmem %s33_s19, 16  ;;  %s548_s28 = scalar_lea.vmem %s33_s19, 32 }
   0xb   :  { %p545_p3 = scmp.ne.s32.totalorder %s33_s19, %s544_s27  ;;  %p549_p4 = scmp.lt.s32.totalorder %s33_s19, %s33_s19 }
   0xc   :  { %p550_p5 = scmp.lt.s32.totalorder %s548_s28, %s544_s27 }
   0xe   :  { %p551_p6 = por %p550_p5, %p549_p4 }
  0x10   :  { %p552_p7 = pnand %p551_p6, %p545_p3 }
  0x12   :  { %555 = shalt.err (!%p552_p7)
}
  0x13   :  { %35 = dma.hbm_to_vmem [thread:$0]  %s813_s1, 16, %s33_s19, [#allocation6]  }
  0x14   :  { %s675_s6 = smov [#allocation8]   ;;  %s676_s8 = smov [#allocation2]  }
  0x15   :  { %s51_s7 = sshll.u32 %s675_s6, 4  ;;  %s19_s9 = sshll.u32 %s676_s8, 4  ;;  %s52_s7 = int_to_ptr.vmem [resolvable:$true] %s51_s7  ;;  %s20_s9 = int_to_ptr.vmem [resolvable:$true] %s19_s9 }
  0x16   :  { %s556_s12 = scalar_lea.hbm %s815_s3, 1024 }
  0x17   :  { %p557_p8 = scmp.ne.s32.totalorder %s815_s3, %s556_s12  ;;  %p560_p9 = scmp.lt.u32.totalorder %s556_s12, %s815_s3 }
  0x19   :  { %p562_p10 = pnand %p560_p9, %p557_p8 }
  0x1b   :  { %565 = shalt.err (!%p562_p10)
}
  0x1c   :  { %s566_s1 = scalar_lea.vmem %s52_s7, 1024  ;;  %p571_p12 = scmp.lt.s32.totalorder %s52_s7, %s52_s7 }
  0x1d   :  { %p567_p11 = scmp.ne.s32.totalorder %s52_s7, %s566_s1  ;;  %p572_p13 = scmp.lt.s32.totalorder %s566_s1, %s566_s1 }
  0x1f   :  { %p573_p0 = por %p572_p13, %p571_p12 }
  0x21   :  { %p574_p1 = pnand %p573_p0, %p567_p11 }
  0x23   :  { %577 = shalt.err (!%p574_p1)
}
  0x24   :  { %s677_s17 = smov 64   ;;  %s678_s18 = smov 4  }
  0x25   :  { %57 = dma.hbm_to_vmem [thread:$0]  %s815_s3, 1024, %s52_s7, [#allocation9], %s677_s17, %s677_s17, %s678_s18  }
  0x26   :  { %s578_s23 = scalar_lea.hbm %s812_s0, 1024 }
  0x27   :  { %p579_p2 = scmp.ne.s32.totalorder %s812_s0, %s578_s23  ;;  %p582_p3 = scmp.lt.u32.totalorder %s578_s23, %s812_s0 }
  0x29   :  { %p584_p4 = pnand %p582_p3, %p579_p2 }
  0x2b   :  { %587 = shalt.err (!%p584_p4)
}
  0x2c   :  { %s588_s28 = scalar_lea.vmem %s20_s9, 1024  ;;  %p593_p6 = scmp.lt.s32.totalorder %s20_s9, %s20_s9 }
  0x2d   :  { %p589_p5 = scmp.ne.s32.totalorder %s20_s9, %s588_s28  ;;  %p594_p7 = scmp.lt.s32.totalorder %s588_s28, %s588_s28 }
  0x2f   :  { %p595_p8 = por %p594_p7, %p593_p6 }
  0x31   :  { %p596_p9 = pnand %p595_p8, %p589_p5 }
  0x33   :  { %599 = shalt.err (!%p596_p9)
}
  0x34   :  { %25 = dma.hbm_to_vmem [thread:$0]  %s812_s0, 1024, %s20_s9, [#allocation3], %s677_s17, %s677_s17, %s678_s18  }
  0x35   :  { %s679_s30 = smov [#allocation7]   ;;  %s680_s7 = smov [#allocation10]  }
  0x36   :  { %s42_s6 = sshll.u32 %s679_s30, 4  ;;  %s64_s8 = sshll.u32 %s680_s7, 4  ;;  %s43_s6 = int_to_ptr.vmem [resolvable:$true] %s42_s6  ;;  %s65_s8 = int_to_ptr.vmem [resolvable:$true] %s64_s8 }
  0x37   :  { %s600_s12 = scalar_lea.hbm %s814_s2, 16 }
  0x38   :  { %p601_p10 = scmp.ne.s32.totalorder %s814_s2, %s600_s12  ;;  %p604_p11 = scmp.lt.u32.totalorder %s600_s12, %s814_s2 }
  0x3a   :  { %p606_p12 = pnand %p604_p11, %p601_p10 }
  0x3c   :  { %609 = shalt.err (!%p606_p12)
}
  0x3d   :  { %s610_s0 = scalar_lea.vmem %s43_s6, 16  ;;  %s614_s9 = scalar_lea.vmem %s43_s6, 32 }
  0x3e   :  { %p611_p13 = scmp.ne.s32.totalorder %s43_s6, %s610_s0  ;;  %p615_p0 = scmp.lt.s32.totalorder %s43_s6, %s43_s6 }
  0x3f   :  { %p616_p1 = scmp.lt.s32.totalorder %s614_s9, %s610_s0 }
  0x41   :  { %p617_p2 = por %p616_p1, %p615_p0 }
  0x43   :  { %p618_p3 = pnand %p617_p2, %p611_p13 }
  0x45   :  { %621 = shalt.err (!%p618_p3)
}
  0x46   :  { %45 = dma.hbm_to_vmem [thread:$0]  %s814_s2, 16, %s43_s6, [#allocation6]  }
  0x47   :  { %s622_s20 = scalar_lea.hbm %s816_s4, 32 }
  0x48   :  { %p623_p4 = scmp.ne.s32.totalorder %s816_s4, %s622_s20  ;;  %p626_p5 = scmp.lt.u32.totalorder %s622_s20, %s816_s4 }
  0x4a   :  { %p628_p6 = pnand %p626_p5, %p623_p4 }
  0x4c   :  { %631 = shalt.err (!%p628_p6)
}
  0x4d   :  { %s632_s25 = scalar_lea.vmem %s65_s8, 32  ;;  %p637_p8 = scmp.lt.s32.totalorder %s65_s8, %s65_s8 }
  0x4e   :  { %p633_p7 = scmp.ne.s32.totalorder %s65_s8, %s632_s25  ;;  %p638_p9 = scmp.lt.s32.totalorder %s632_s25, %s632_s25 }
  0x50   :  { %p639_p10 = por %p638_p9, %p637_p8 }
  0x52   :  { %p640_p11 = pnand %p639_p10, %p633_p7 }
  0x54   :  { %643 = shalt.err (!%p640_p11)
}
  0x55   :  { %67 = dma.hbm_to_vmem [thread:$0]  %s816_s4, 32, %s65_s8, [#allocation9]  }
  0x56   :  { %666 = dma.done.wait [#allocation3], 1024  }
  0x57   :  { %667 = vsyncadd [#allocation3], 4294966272 }
  0x58   :  { %668 = dma.done.wait [#allocation6], 32  }
  0x59   :  { %669 = vsyncadd [#allocation6], 4294967264 }
  0x5a   :  { %670 = dma.done.wait [#allocation9], 1056  }
  0x5b   :  { %671 = vsyncadd [#allocation9], 4294966240  ;;  %vm166_vm0 = vcmask 1041408   ;;  %vm141_vm1 = vcmask 31744   ;;  %v100_v0 = vld [vmem:[#allocation10] sm:$0x3] }
  0x5c   :  { %514 = vmatprep.subr.msk.bf16.mxu0 %vm166_vm0, %v100_v0  ;;  %515 = vmatprep.subr.msk.bf16.mxu1 %vm166_vm0, %v100_v0  ;;  %v168_v1 = vsel %vm166_vm0, %v100_v0, 0  ;;  %v526_v2 = vld [vmem:[#allocation8] sm:$0xff]   ;;  %v528_v4 = vld [vmem:[#allocation8 + $0x8] sm:$0xff]   ;;  %v530_v6 = vld [vmem:[#allocation8 + $0x10] sm:$0xff]   ;;  %s681_s4 = smov [#allocation11]  }
  0x5d   :  { %495 = vmatpush3.bf16.msra.mxu0 %v168_v1  ;;  %513 = vmatpush3.bf16.msra.mxu1 %v168_v1  ;;  %v527_v3 = vld [vmem:[#allocation8 + $0x20] sm:$0xff]   ;;  %v529_v5 = vld [vmem:[#allocation8 + $0x28] sm:$0xff]   ;;  %v531_v7 = vld [vmem:[#allocation8 + $0x30] sm:$0xff]   ;;  %s414_s27 = sshll.u32 %s681_s4, 4  ;;  %s415_s27 = int_to_ptr.vmem [resolvable:$true] %s414_s27 }
  0x5e   :  { %496 = vmatprep.mubr.msk.bf16.mxu0 %vm141_vm1, %v526_v2  ;;  %504 = vmatprep.mubr.msk.bf16.mxu1 %vm141_vm1, %v527_v3  ;;  %v532_v8 = vld [vmem:[#allocation8 + $0x18] sm:$0xff]   ;;  %v478_v10 = vld [vmem:[#allocation2 + $0x8] sm:$0xff]   ;;  %v479_v27 = vld [vmem:[#allocation2 + $0x10] sm:$0xff]   ;;  %s644_s28 = scalar_lea.vmem %s415_s27, 2048  ;;  %p649_p13 = scmp.lt.s32.totalorder %s415_s27, %s415_s27 }
  0x5f   :  { %v533_v9 = vld [vmem:[#allocation8 + $0x38] sm:$0xff]   ;;  %v482_v11 = vld [vmem:[#allocation2 + $0x28] sm:$0xff]   ;;  %v452_v14 = vunpack.c.l.bf16 %v478_v10  ;;  %v453_v20 = vunpack.c.h.bf16 %v478_v10  ;;  %v483_v31 = vld [vmem:[#allocation2 + $0x30] sm:$0xff]   ;;  %v456_v38 = vunpack.c.l.bf16 %v479_v27  ;;  %v457_v49 = vunpack.c.h.bf16 %v479_v27  ;;  %p645_p12 = scmp.ne.s32.totalorder %s415_s27, %s644_s28  ;;  %p650_p0 = scmp.lt.s32.totalorder %s644_s28, %s644_s28 }
  0x60   :  { %497 = vmatmul.mubr.msk.bf16.vlgmr.msra.gmra.mrb[0].mxu0 %vm141_vm1, %v528_v4  ;;  %505 = vmatmul.mubr.msk.bf16.vlgmr.msra.gmra.mrb[0].mxu1 %vm141_vm1, %v529_v5  ;;  %v447_v12 = vld [vmem:[#allocation2] sm:$0xff]   ;;  %v468_v16 = vunpack.c.l.bf16 %v482_v11  ;;  %v480_v18 = vld [vmem:[#allocation2 + $0x18] sm:$0xff]   ;;  %v469_v21 = vunpack.c.h.bf16 %v482_v11  ;;  %v472_v41 = vunpack.c.l.bf16 %v483_v31  ;;  %v473_v57 = vunpack.c.h.bf16 %v483_v31 }
  0x61   :  { %500 = vmatprep.mubr.msk.bf16.mxu0 %vm141_vm1, %v530_v6  ;;  %508 = vmatprep.mubr.msk.bf16.mxu1 %vm141_vm1, %v531_v7  ;;  %v481_v13 = vld [vmem:[#allocation2 + $0x20] sm:$0xff]   ;;  %v448_v17 = vunpack.c.l.bf16 %v447_v12  ;;  %v449_v22 = vunpack.c.h.bf16 %v447_v12  ;;  %v460_v25 = vunpack.c.l.bf16 %v480_v18  ;;  %v484_v26 = vld [vmem:[#allocation2 + $0x38] sm:$0xff]   ;;  %v461_v44 = vunpack.c.h.bf16 %v480_v18  ;;  %p651_p1 = por %p650_p0, %p649_p13 }
  0x62   :  { %v444_v15 = vld [vmem:[#allocation5] ss:$0 sm:$0xff]  ;;  %v464_v19 = vunpack.c.l.bf16 %v481_v13  ;;  %v465_v23 = vunpack.c.h.bf16 %v481_v13  ;;  %v782_v28 = vld [vmem:[#allocation7] ss:$0 sm:$0xff]  ;;  %v476_v37 = vunpack.c.l.bf16 %v484_v26  ;;  %v477_v45 = vunpack.c.h.bf16 %v484_v26 }
  0x63   :  { %v308_v24 = vmul.f32 %v452_v14, %v444_v15  ;;  %v316_v29 = vmul.f32 %v468_v16, %v444_v15  ;;  %v306_v30 = vmul.f32 %v448_v17, %v444_v15  ;;  %v309_v33 = vmul.f32 %v453_v20, %v444_v15  ;;  %p652_p2 = pnand %p651_p1, %p645_p12 }
  0x64   :  { %v314_v32 = vmul.f32 %v464_v19, %v444_v15  ;;  %v317_v34 = vmul.f32 %v469_v21, %v444_v15  ;;  %v307_v35 = vmul.f32 %v449_v22, %v444_v15  ;;  %v315_v36 = vmul.f32 %v465_v23, %v444_v15 }
  0x65   :  { %v331_v39 = vadd.f32 %v782_v28, %v308_v24  ;;  %v312_v40 = vmul.f32 %v460_v25, %v444_v15  ;;  %v339_v42 = vadd.f32 %v782_v28, %v316_v29  ;;  %v329_v43 = vadd.f32 %v782_v28, %v306_v30 }
  0x66   :  { %v337_v46 = vadd.f32 %v782_v28, %v314_v32  ;;  %v332_v47 = vadd.f32 %v782_v28, %v309_v33  ;;  %v340_v48 = vadd.f32 %v782_v28, %v317_v34  ;;  %v330_v50 = vadd.f32 %v782_v28, %v307_v35 }
  0x67   :  { %v338_v51 = vadd.f32 %v782_v28, %v315_v36  ;;  %v320_v52 = vmul.f32 %v476_v37, %v444_v15  ;;  %v310_v53 = vmul.f32 %v456_v38, %v444_v15  ;;  %v347_v54 = vmax.f32 %v331_v39, 0.0 }
  0x68   :  { %501 = vmatmul.mubr.msk.bf16.gmra.mrb[4].mxu0 %vm141_vm1, %v532_v8  ;;  %509 = vmatmul.mubr.msk.bf16.gmra.mrb[4].mxu1 %vm141_vm1, %v533_v9  ;;  %v335_v55 = vadd.f32 %v782_v28, %v312_v40  ;;  %v318_v56 = vmul.f32 %v472_v41, %v444_v15  ;;  %v355_v58 = vmax.f32 %v339_v42, 0.0  ;;  %v345_v59 = vmax.f32 %v329_v43, 0.0 }
  0x69   :  { %v313_v60 = vmul.f32 %v461_v44, %v444_v15  ;;  %v321_v61 = vmul.f32 %v477_v45, %v444_v15  ;;  %v353_v62 = vmax.f32 %v337_v46, 0.0  ;;  %v348_v63 = vmax.f32 %v332_v47, 0.0 }
  0x6a   :  { %v356_v0 = vmax.f32 %v340_v48, 0.0  ;;  %v311_v1 = vmul.f32 %v457_v49, %v444_v15  ;;  %v346_v3 = vmax.f32 %v330_v50, 0.0  ;;  %v354_v4 = vmax.f32 %v338_v51, 0.0 }
  0x6b   :  { %v343_v5 = vadd.f32 %v782_v28, %v320_v52  ;;  %v333_v6 = vadd.f32 %v782_v28, %v310_v53  ;;  %v351_v10 = vmax.f32 %v335_v55, 0.0  ;;  %v341_v11 = vadd.f32 %v782_v28, %v318_v56 }
  0x6c   :  { %v319_v12 = vmul.f32 %v473_v57, %v444_v15  ;;  %v336_v18 = vadd.f32 %v782_v28, %v313_v60  ;;  %v344_v19 = vadd.f32 %v782_v28, %v321_v61  ;;  %v334_v25 = vadd.f32 %v782_v28, %v311_v1 }
  0x6d   :  { %v359_v37 = vmax.f32 %v343_v5, 0.0  ;;  %v349_v38 = vmax.f32 %v333_v6, 0.0  ;;  %v357_v40 = vmax.f32 %v341_v11, 0.0 }
  0x6e   :  { %v342_v34 = vadd.f32 %v782_v28, %v319_v12  ;;  %v352_v41 = vmax.f32 %v336_v18, 0.0  ;;  %v360_v43 = vmax.f32 %v344_v19, 0.0  ;;  %v350_v44 = vmax.f32 %v334_v25, 0.0 }
  0x70   :  { %v358_v47 = vmax.f32 %v342_v34, 0.0 }
 0x133   :  { %v498_v2 = vpop.f32.mrb[0].mxu0  ;;  %v506_v8 = vpop.f32.mrb[0].mxu1 }
 0x134   :  { %v363_v7 = vadd.f32 %v498_v2, %v347_v54  ;;  %v204_v9 = vpop.f32.mrb[1].mxu0  ;;  %v371_v13 = vadd.f32 %v506_v8, %v355_v58  ;;  %v236_v16 = vpop.f32.mrb[1].mxu1 }
 0x135   :  { %v361_v14 = vadd.f32 %v345_v59, %v204_v9  ;;  %v499_v17 = vpop.f32.mrb[2].mxu0  ;;  %v369_v21 = vadd.f32 %v353_v62, %v236_v16  ;;  %v507_v23 = vpop.f32.mrb[2].mxu1 }
 0x136   :  { %v379_v20 = vmax.f32 %v363_v7, 0.0  ;;  %v364_v22 = vadd.f32 %v499_v17, %v348_v63  ;;  %v207_v24 = vpop.f32.mrb[3].mxu0  ;;  %v387_v26 = vmax.f32 %v371_v13, 0.0  ;;  %v372_v29 = vadd.f32 %v507_v23, %v356_v0  ;;  %v239_v15 = vpop.f32.mrb[3].mxu1 }
 0x137   :  { %v377_v27 = vmax.f32 %v361_v14, 0.0  ;;  %v362_v30 = vadd.f32 %v346_v3, %v207_v24  ;;  %v385_v31 = vmax.f32 %v369_v21, 0.0  ;;  %v370_v33 = vadd.f32 %v354_v4, %v239_v15 }
 0x138   :  { %395 = vst [vmem:[#allocation11 + $0x10] sm:$0xff] %v379_v20  ;;  %v380_v32 = vmax.f32 %v364_v22, 0.0  ;;  %403 = vst [vmem:[#allocation11 + $0x50] sm:$0xff] %v387_v26  ;;  %v388_v35 = vmax.f32 %v372_v29, 0.0 }
 0x139   :  { %393 = vst [vmem:[#allocation11] sm:$0xff] %v377_v27  ;;  %v378_v36 = vmax.f32 %v362_v30, 0.0  ;;  %401 = vst [vmem:[#allocation11 + $0x40] sm:$0xff] %v385_v31  ;;  %v386_v39 = vmax.f32 %v370_v33, 0.0 }
 0x13a   :  { %396 = vst [vmem:[#allocation11 + $0x18] sm:$0xff] %v380_v32  ;;  %404 = vst [vmem:[#allocation11 + $0x58] sm:$0xff] %v388_v35 }
 0x13b   :  { %394 = vst [vmem:[#allocation11 + $0x8] sm:$0xff] %v378_v36  ;;  %v502_v42 = vpop.f32.mrb[4].mxu0  ;;  %402 = vst [vmem:[#allocation11 + $0x48] sm:$0xff] %v386_v39  ;;  %v510_v46 = vpop.f32.mrb[4].mxu1 }
 0x13c   :  { %v367_v45 = vadd.f32 %v502_v42, %v351_v10  ;;  %v220_v28 = vpop.f32.mrb[5].mxu0  ;;  %v375_v48 = vadd.f32 %v510_v46, %v359_v37  ;;  %v252_v50 = vpop.f32.mrb[5].mxu1 }
 0x13d   :  { %v365_v49 = vadd.f32 %v349_v38, %v220_v28  ;;  %v503_v51 = vpop.f32.mrb[6].mxu0  ;;  %v373_v53 = vadd.f32 %v357_v40, %v252_v50  ;;  %v511_v55 = vpop.f32.mrb[6].mxu1 }
 0x13e   :  { %v383_v52 = vmax.f32 %v367_v45, 0.0  ;;  %v368_v54 = vadd.f32 %v503_v51, %v352_v41  ;;  %v223_v56 = vpop.f32.mrb[7].mxu0  ;;  %v391_v57 = vmax.f32 %v375_v48, 0.0  ;;  %v376_v59 = vadd.f32 %v511_v55, %v360_v43  ;;  %v255_v61 = vpop.f32.mrb[7].mxu1 }
 0x13f   :  { %v381_v58 = vmax.f32 %v365_v49, 0.0  ;;  %v366_v60 = vadd.f32 %v350_v44, %v223_v56  ;;  %v389_v62 = vmax.f32 %v373_v53, 0.0  ;;  %v374_v0 = vadd.f32 %v358_v47, %v255_v61 }
 0x140   :  { %399 = vst [vmem:[#allocation11 + $0x30] sm:$0xff] %v383_v52  ;;  %v384_v63 = vmax.f32 %v368_v54, 0.0  ;;  %407 = vst [vmem:[#allocation11 + $0x70] sm:$0xff] %v391_v57  ;;  %v392_v1 = vmax.f32 %v376_v59, 0.0 }
 0x141   :  { %397 = vst [vmem:[#allocation11 + $0x20] sm:$0xff] %v381_v58  ;;  %v382_v2 = vmax.f32 %v366_v60, 0.0  ;;  %405 = vst [vmem:[#allocation11 + $0x60] sm:$0xff] %v389_v62  ;;  %v390_v3 = vmax.f32 %v374_v0, 0.0 }
 0x142   :  { %400 = vst [vmem:[#allocation11 + $0x38] sm:$0xff] %v384_v63  ;;  %408 = vst [vmem:[#allocation11 + $0x78] sm:$0xff] %v392_v1 }
 0x143   :  { %398 = vst [vmem:[#allocation11 + $0x28] sm:$0xff] %v382_v2  ;;  %406 = vst [vmem:[#allocation11 + $0x68] sm:$0xff] %v390_v3 }
 0x144   :  { %655 = shalt.err (!%p652_p2)
}
 0x145   :  { %s656_s30 = scalar_lea.hbm %s817_s5, 2048 }
 0x146   :  { %p657_p3 = scmp.ne.s32.totalorder %s817_s5, %s656_s30  ;;  %p660_p4 = scmp.lt.u32.totalorder %s656_s30, %s817_s5 }
 0x148   :  { %p662_p5 = pnand %p660_p4, %p657_p3 }
 0x14a   :  { %665 = shalt.err (!%p662_p5)
}
 0x14b   :  { %s682_s11 = smov 128   ;;  %s683_s12 = smov 8  }
 0x14c   :  { %420 = dma.vmem_to_hbm [thread:$0]  %s415_s27, 2048, %s817_s5, [#allocation4], %s682_s11, %s682_s11, %s683_s12  }
 0x14d   :  { %672 = dma.done.wait [#allocation4], 2048  }
 0x14e   :  { %673 = vsyncadd [#allocation4], 4294965248 }
 0x14f   :  { %424 = vsyncpa [#allocation3], 1 }
 0x150   :  { %425 = vsyncpa [#allocation6], 1 }
 0x151   :  { %426 = vsyncpa [#allocation9], 1 }
 0x152   :  { %427 = vsyncpa [#allocation4], 1 }

</bundles_post_ra>
